<compile_context>
chip_gen: v7x
topology: tpu7x:2x2x1
jax: 0.10.0
libtpu: 0.0.40
codegen_flags: <defaults>
</compile_context>

<pallas_src>
import functools

import jax
import jax.numpy as jnp
from jax.experimental import pallas as pl
from jax.experimental.pallas import tpu as pltpu

IN_DIM = 100
H1_DIM = 256
H2_DIM = 512
OUT_DIM = 28 * 28          # 784

IN_PAD = 128               # lane-aligned K for the first matmul
OUT_PAD = 896              # 7 * 128, lane-aligned N for the last matmul / output


def generator_kernel(x_ref, w1_ref, b1_ref, w2_ref, b2_ref, w3_ref, b3_ref, o_ref):
    # 3 MXU matmuls (bf16 operands, f32 accumulation) + VPU bias/ReLU + EUP tanh.
    x = x_ref[...].astype(jnp.bfloat16)
    h1 = jnp.dot(x, w1_ref[...], preferred_element_type=jnp.float32) + b1_ref[...]
    h1 = jnp.maximum(h1, 0.0)                                        # ReLU (f32)
    h2 = jnp.dot(h1.astype(jnp.bfloat16), w2_ref[...],
                 preferred_element_type=jnp.float32) + b2_ref[...]
    h2 = jnp.maximum(h2, 0.0)                                        # ReLU (f32)
    out = jnp.dot(h2.astype(jnp.bfloat16), w3_ref[...],
                  preferred_element_type=jnp.float32) + b3_ref[...]
    o_ref[...] = jnp.tanh(out).astype(o_ref.dtype)                   # Tanh (f32)


@functools.partial(jax.jit, static_argnames=("batch_tile",))
def generator_forward(x, params, batch_tile=None):
    B = x.shape[0]
    w1, b1, w2, b2, w3, b3 = params

    # Pick a batch tile: large enough to fill MXU rows, and (when B allows)
    # keep >=2 grid steps so dimension_semantics=("parallel",) can shard the
    # batch axis across TensorCores (v7x megacore).
    if batch_tile is None:
        if B <= 8:
            batch_tile = 8
        else:
            batch_tile = min(256, ((pl.cdiv(B, 2) + 7) // 8) * 8)
    B_pad = pl.cdiv(B, batch_tile) * batch_tile

    # Lane-aligned zero padding, done in the wrapper (sliced back at the end).
    x_p = jnp.zeros((B_pad, IN_PAD), jnp.float32).at[:B, :IN_DIM].set(
        x.astype(jnp.float32))
    w1_p = jnp.zeros((IN_PAD, H1_DIM), jnp.bfloat16).at[:IN_DIM, :].set(
        w1.astype(jnp.bfloat16))
    w2_b = w2.astype(jnp.bfloat16)
    w3_p = jnp.zeros((H2_DIM, OUT_PAD), jnp.bfloat16).at[:, :OUT_DIM].set(
        w3.astype(jnp.bfloat16))
    b3_p = jnp.zeros((1, OUT_PAD), jnp.float32).at[:, :OUT_DIM].set(b3)

    grid = (B_pad // batch_tile,)

    # x / output tiled over batch; weights & biases are small -> full blocks
    # with constant index_map (revisited, DMA'd once).
    in_specs = [
        pl.BlockSpec((batch_tile, IN_PAD), lambda i: (i, 0)),   # x
        pl.BlockSpec((IN_PAD, H1_DIM), lambda i: (0, 0)),       # w1
        pl.BlockSpec((1, H1_DIM), lambda i: (0, 0)),            # b1
        pl.BlockSpec((H1_DIM, H2_DIM), lambda i: (0, 0)),       # w2
        pl.BlockSpec((1, H2_DIM), lambda i: (0, 0)),            # b2
        pl.BlockSpec((H2_DIM, OUT_PAD), lambda i: (0, 0)),      # w3
        pl.BlockSpec((1, OUT_PAD), lambda i: (0, 0)),           # b3
    ]
    out_spec = pl.BlockSpec((batch_tile, OUT_PAD), lambda i: (i, 0))

    flops = 2 * B_pad * (IN_PAD * H1_DIM + H1_DIM * H2_DIM + H2_DIM * OUT_PAD)
    bytes_accessed = (
        x_p.size * 4
        + (w1_p.size + w2_b.size + w3_p.size) * 2
        + (b1.size + b2.size + b3_p.size) * 4
        + B_pad * OUT_PAD * 4)

    out = pl.pallas_call(
        generator_kernel,
        out_shape=jax.ShapeDtypeStruct((B_pad, OUT_PAD), jnp.float32),
        grid_spec=pltpu.PrefetchScalarGridSpec(
            num_scalar_prefetch=0,
            grid=grid,
            in_specs=in_specs,
            out_specs=out_spec,
        ),
        compiler_params=pltpu.CompilerParams(
            dimension_semantics=("parallel",),
            vmem_limit_bytes=32 * 1024 * 1024,
        ),
        cost_estimate=pl.CostEstimate(
            flops=flops,
            transcendentals=B_pad * OUT_PAD,
            bytes_accessed=bytes_accessed,
        ),
    )(x_p, w1_p, b1, w2_b, b2, w3_p, b3_p)

    return out[:B, :OUT_DIM]


def init_params(key):
    """Deterministic init mimicking PyTorch nn.Linear default (U(-1/sqrt(fan_in), ...))."""
    def linear_init(k, fan_in, fan_out):
        kw, kb = jax.random.split(k)
        bound = 1.0 / (fan_in ** 0.5)
        w = jax.random.uniform(kw, (fan_in, fan_out), jnp.float32, -bound, bound)
        b = jax.random.uniform(kb, (1, fan_out), jnp.float32, -bound, bound)
        return w, b

    k1, k2, k3 = jax.random.split(key, 3)
    w1, b1 = linear_init(k1, IN_DIM, H1_DIM)
    w2, b2 = linear_init(k2, H1_DIM, H2_DIM)
    w3, b3 = linear_init(k3, H2_DIM, OUT_DIM)
    return (w1, b1, w2, b2, w3, b3)


def reference_forward(x, params):
    w1, b1, w2, b2, w3, b3 = params
    h1 = jnp.maximum(x @ w1 + b1, 0.0)
    h2 = jnp.maximum(h1 @ w2 + b2, 0.0)
    return jnp.tanh(h2 @ w3 + b3)


if __name__ == "__main__":
    key = jax.random.PRNGKey(0)
    k_params, k_x = jax.random.split(key)

    params = init_params(k_params)
    x = jax.random.normal(k_x, (8, IN_DIM), jnp.float32)  # latent noise, batch=8

    out = generator_forward(x, params)
    out = jax.block_until_ready(out)

    ref = reference_forward(x, params)   # f32 reference
    assert out.shape == (8, OUT_DIM), out.shape
    # bf16 matmul operands (f32 accumulation) -> looser tolerance than pure f32.
    assert jnp.allclose(out, ref, atol=5e-2, rtol=0.0), (
        "mismatch vs reference, max abs err = "
        f"{float(jnp.max(jnp.abs(out - ref)))}")

    print("KERNEL_OK")
</pallas_src>

<mosaic_0001>
module attributes {stable_mosaic.version = 11 : i64} {
  func.func @generator_kernel(%arg0: i32, %arg1: memref<8x128xf32, #tpu.memory_space<vmem>>, %arg2: memref<128x256xbf16, #tpu.memory_space<vmem>>, %arg3: memref<1x256xf32, #tpu.memory_space<vmem>>, %arg4: memref<256x512xbf16, #tpu.memory_space<vmem>>, %arg5: memref<1x512xf32, #tpu.memory_space<vmem>>, %arg6: memref<512x896xbf16, #tpu.memory_space<vmem>>, %arg7: memref<1x896xf32, #tpu.memory_space<vmem>>, %arg8: memref<8x896xf32, #tpu.memory_space<vmem>>) attributes {dimension_semantics = [#tpu.dimension_semantics<parallel>], iteration_bounds = array<i64: 1>, scalar_prefetch = 0 : i64, scratch_operands = 0 : i64, tpu.core_type = #tpu.core_type<tc>, window_params = [{transform_indices = @transform_0, window_bounds = array<i64: 8, 128>}, {pipeline_mode = #tpu.pipeline_mode<synchronous>, transform_indices = @transform_1, window_bounds = array<i64: 128, 256>}, {pipeline_mode = #tpu.pipeline_mode<synchronous>, transform_indices = @transform_2, window_bounds = array<i64: 1, 256>}, {pipeline_mode = #tpu.pipeline_mode<synchronous>, transform_indices = @transform_3, window_bounds = array<i64: 256, 512>}, {pipeline_mode = #tpu.pipeline_mode<synchronous>, transform_indices = @transform_4, window_bounds = array<i64: 1, 512>}, {pipeline_mode = #tpu.pipeline_mode<synchronous>, transform_indices = @transform_5, window_bounds = array<i64: 512, 896>}, {pipeline_mode = #tpu.pipeline_mode<synchronous>, transform_indices = @transform_6, window_bounds = array<i64: 1, 896>}, {transform_indices = @transform_7, window_bounds = array<i64: 8, 896>}]} {
    %c0 = arith.constant 0 : index
    %c0_0 = arith.constant 0 : index
    %0 = vector.load %arg1[%c0, %c0_0] : memref<8x128xf32, #tpu.memory_space<vmem>>, vector<8x128xf32>
    %1 = arith.truncf %0 : vector<8x128xf32> to vector<8x128xbf16>
    %c0_1 = arith.constant 0 : index
    %c0_2 = arith.constant 0 : index
    %2 = vector.load %arg2[%c0_1, %c0_2] : memref<128x256xbf16, #tpu.memory_space<vmem>>, vector<128x256xbf16>
    %cst = arith.constant dense<0.000000e+00> : vector<8x256xf32>
    %3 = tpu.matmul %1, %2, %cst {dimension_numbers = #tpu.dot_dimension_numbers<[1], [0], [0], [1], [0, 0, 1, 1], [], []>} : vector<8x128xbf16>, vector<128x256xbf16>, vector<8x256xf32> -> vector<8x256xf32>
    %c0_3 = arith.constant 0 : index
    %c0_4 = arith.constant 0 : index
    %4 = vector.load %arg3[%c0_3, %c0_4] : memref<1x256xf32, #tpu.memory_space<vmem>>, vector<1x256xf32>
    %5 = vector.broadcast %4 : vector<1x256xf32> to vector<8x256xf32>
    %6 = arith.addf %3, %5 : vector<8x256xf32>
    %cst_5 = arith.constant 0.000000e+00 : f32
    %7 = vector.broadcast %cst_5 : f32 to vector<8x256xf32>
    %8 = arith.maximumf %6, %7 : vector<8x256xf32>
    %9 = arith.truncf %8 : vector<8x256xf32> to vector<8x256xbf16>
    %c0_6 = arith.constant 0 : index
    %c0_7 = arith.constant 0 : index
    %10 = vector.load %arg4[%c0_6, %c0_7] : memref<256x512xbf16, #tpu.memory_space<vmem>>, vector<256x512xbf16>
    %cst_8 = arith.constant dense<0.000000e+00> : vector<8x512xf32>
    %11 = tpu.matmul %9, %10, %cst_8 {dimension_numbers = #tpu.dot_dimension_numbers<[1], [0], [0], [1], [0, 0, 1, 1], [], []>} : vector<8x256xbf16>, vector<256x512xbf16>, vector<8x512xf32> -> vector<8x512xf32>
    %c0_9 = arith.constant 0 : index
    %c0_10 = arith.constant 0 : index
    %12 = vector.load %arg5[%c0_9, %c0_10] : memref<1x512xf32, #tpu.memory_space<vmem>>, vector<1x512xf32>
    %13 = vector.broadcast %12 : vector<1x512xf32> to vector<8x512xf32>
    %14 = arith.addf %11, %13 : vector<8x512xf32>
    %cst_11 = arith.constant 0.000000e+00 : f32
    %15 = vector.broadcast %cst_11 : f32 to vector<8x512xf32>
    %16 = arith.maximumf %14, %15 : vector<8x512xf32>
    %17 = arith.truncf %16 : vector<8x512xf32> to vector<8x512xbf16>
    %c0_12 = arith.constant 0 : index
    %c0_13 = arith.constant 0 : index
    %18 = vector.load %arg6[%c0_12, %c0_13] : memref<512x896xbf16, #tpu.memory_space<vmem>>, vector<512x896xbf16>
    %cst_14 = arith.constant dense<0.000000e+00> : vector<8x896xf32>
    %19 = tpu.matmul %17, %18, %cst_14 {dimension_numbers = #tpu.dot_dimension_numbers<[1], [0], [0], [1], [0, 0, 1, 1], [], []>} : vector<8x512xbf16>, vector<512x896xbf16>, vector<8x896xf32> -> vector<8x896xf32>
    %c0_15 = arith.constant 0 : index
    %c0_16 = arith.constant 0 : index
    %20 = vector.load %arg7[%c0_15, %c0_16] : memref<1x896xf32, #tpu.memory_space<vmem>>, vector<1x896xf32>
    %21 = vector.broadcast %20 : vector<1x896xf32> to vector<8x896xf32>
    %22 = arith.addf %19, %21 : vector<8x896xf32>
    %23 = math.tanh %22 : vector<8x896xf32>
    %c0_17 = arith.constant 0 : index
    %c0_18 = arith.constant 0 : index
    %24 = vector.load %arg8[%c0_17, %c0_18] : memref<8x896xf32, #tpu.memory_space<vmem>>, vector<8x896xf32>
    tpu.vector_store %arg8[%c0_17, %c0_18], %23 {strides = array<i32>} : memref<8x896xf32, #tpu.memory_space<vmem>>, vector<8x896xf32>,
    return
  }
  func.func @transform_0(%arg0: i32) -> (i32, i32) {
    %c0_i32 = arith.constant 0 : i32
    %c0_i32_0 = arith.constant 0 : i32
    return %arg0, %c0_i32 : i32, i32
  }
  func.func @transform_1(%arg0: i32) -> (i32, i32) {
    %c0_i32 = arith.constant 0 : i32
    %c0_i32_0 = arith.constant 0 : i32
    %c0_i32_1 = arith.constant 0 : i32
    return %c0_i32, %c0_i32_0 : i32, i32
  }
  func.func @transform_2(%arg0: i32) -> (i32, i32) {
    %c0_i32 = arith.constant 0 : i32
    %c0_i32_0 = arith.constant 0 : i32
    %c0_i32_1 = arith.constant 0 : i32
    return %c0_i32, %c0_i32_0 : i32, i32
  }
  func.func @transform_3(%arg0: i32) -> (i32, i32) {
    %c0_i32 = arith.constant 0 : i32
    %c0_i32_0 = arith.constant 0 : i32
    %c0_i32_1 = arith.constant 0 : i32
    return %c0_i32, %c0_i32_0 : i32, i32
  }
  func.func @transform_4(%arg0: i32) -> (i32, i32) {
    %c0_i32 = arith.constant 0 : i32
    %c0_i32_0 = arith.constant 0 : i32
    %c0_i32_1 = arith.constant 0 : i32
    return %c0_i32, %c0_i32_0 : i32, i32
  }
  func.func @transform_5(%arg0: i32) -> (i32, i32) {
    %c0_i32 = arith.constant 0 : i32
    %c0_i32_0 = arith.constant 0 : i32
    %c0_i32_1 = arith.constant 0 : i32
    return %c0_i32, %c0_i32_0 : i32, i32
  }
  func.func @transform_6(%arg0: i32) -> (i32, i32) {
    %c0_i32 = arith.constant 0 : i32
    %c0_i32_0 = arith.constant 0 : i32
    %c0_i32_1 = arith.constant 0 : i32
    return %c0_i32, %c0_i32_0 : i32, i32
  }
  func.func @transform_7(%arg0: i32) -> (i32, i32) {
    %c0_i32 = arith.constant 0 : i32
    %c0_i32_0 = arith.constant 0 : i32
    return %arg0, %c0_i32 : i32, i32
  }
}

</mosaic_0001>

<bundles_post_ra>
// kernel: generator_forward.1
= control target key start
LH: loop header
LB: loop body
LE: loop exit
PB: predicated region body
PF: predicated region fallthrough
CT: control target
= control target key end

     0   :  { %v3324_v2 = vmov 0   ;;  %s4362_s0 = inlined_call_operand.vmem [shape: f32[8,128], index: 0, kind: input, shape index: {}]   ;;  %s4363_s1 = inlined_call_operand.vmem [shape: bf16[128,256], index: 1, kind: input, shape index: {}]   ;;  %s4364_s2 = inlined_call_operand.vmem [shape: f32[1,256], index: 2, kind: input, shape index: {}]   ;;  %s4365_s3 = inlined_call_operand.vmem [shape: bf16[256,512], index: 3, kind: input, shape index: {}]   ;;  %s4366_s4 = inlined_call_operand.vmem [shape: f32[1,512], index: 4, kind: input, shape index: {}]   ;;  %s4367_s5 = inlined_call_operand.vmem [shape: bf16[512,896], index: 5, kind: input, shape index: {}]   ;;  %s4368_s6 = inlined_call_operand.vmem [shape: f32[1,896], index: 6, kind: input, shape index: {}]   ;;  %s4369_s7 = inlined_call_operand.hbm [shape: f32[8,896], index: 7, kind: output, shape index: {}]  }
   0x1   :  { %v2846_v0 = vld [vmem:[%s4363_s1 + $0x4] ss:$8 sps:$4 sm:$0xff]   ;;  %v2848_v1 = vld [vmem:[%s4363_s1] ss:$8 sps:$4 sm:$0xff]   ;;  %170 = vmatprep.mubr.bf16.mxu0 %v3324_v2  ;;  %v2849_v3 = vld [vmem:[%s4363_s1 + $0x14] ss:$8 sps:$4 sm:$0xff]  }
   0x2   :  { %138 = vmatprep.subr.bf16.mxu0 %v2846_v0  ;;  %v2851_v4 = vld [vmem:[%s4363_s1 + $0x10] ss:$8 sps:$4 sm:$0xff]   ;;  %v2852_v5 = vld [vmem:[%s4363_s1 + $0x24] ss:$8 sps:$4 sm:$0xff]   ;;  %v2854_v6 = vld [vmem:[%s4363_s1 + $0x20] ss:$8 sps:$4 sm:$0xff]  }
   0x3   :  { %139 = vmatpush1.bf16.msra.mxu0 %v2848_v1  ;;  %v2855_v7 = vld [vmem:[%s4363_s1 + $0x34] ss:$8 sps:$4 sm:$0xff]   ;;  %v2857_v8 = vld [vmem:[%s4363_s1 + $0x30] ss:$8 sps:$4 sm:$0xff]   ;;  %v2858_v10 = vld [vmem:[%s4363_s1 + $0x44] ss:$8 sps:$4 sm:$0xff]  }
   0x4   :  { %140 = vmatprep.subr.bf16.mxu0 %v2849_v3  ;;  %v2870_v9 = vld [vmem:[%s4365_s3 + $0x4] ss:$16 sps:$4 sm:$0xff]   ;;  %v2875_v11 = vld [vmem:[%s4365_s3] ss:$16 sps:$4 sm:$0xff]   ;;  %v2874_v27 = vld [vmem:[%s4365_s3 + $0xc] ss:$16 sps:$4 sm:$0xff]  }
   0x5   :  { %589 = vmatprep.subr.bf16.mxu1 %v2870_v9  ;;  %v2876_v12 = vld [vmem:[%s4365_s3 + $0x24] ss:$16 sps:$4 sm:$0xff]   ;;  %v2860_v13 = vld [vmem:[%s4363_s1 + $0x40] ss:$8 sps:$4 sm:$0xff]   ;;  %v2863_v17 = vld [vmem:[%s4363_s1 + $0x50] ss:$8 sps:$4 sm:$0xff]  }
   0x6   :  { %v2861_v14 = vld [vmem:[%s4363_s1 + $0x54] ss:$8 sps:$4 sm:$0xff]   ;;  %590 = vmatpush1.bf16.msra.mxu1 %v2875_v11  ;;  %v2881_v15 = vld [vmem:[%s4365_s3 + $0x20] ss:$16 sps:$4 sm:$0xff]   ;;  %v2864_v18 = vld [vmem:[%s4363_s1 + $0x64] ss:$8 sps:$4 sm:$0xff]  }
   0x7   :  { %141 = vmatpush1.bf16.msra.mxu0 %v2851_v4  ;;  %591 = vmatprep.subr.bf16.mxu1 %v2876_v12  ;;  %v2882_v16 = vld [vmem:[%s4365_s3 + $0x44] ss:$16 sps:$4 sm:$0xff]   ;;  %v2887_v19 = vld [vmem:[%s4365_s3 + $0x40] ss:$16 sps:$4 sm:$0xff]   ;;  %v2872_v31 = vld [vmem:[%s4365_s3 + $0x8] ss:$16 sps:$4 sm:$0xff]  }
   0x8   :  { %142 = vmatprep.subr.bf16.mxu0 %v2852_v5  ;;  %v2888_v20 = vld [vmem:[%s4365_s3 + $0x64] ss:$16 sps:$4 sm:$0xff]   ;;  %v2866_v21 = vld [vmem:[%s4363_s1 + $0x60] ss:$8 sps:$4 sm:$0xff]   ;;  %v2869_v25 = vld [vmem:[%s4363_s1 + $0x70] ss:$8 sps:$4 sm:$0xff]  }
   0x9   :  { %v2867_v22 = vld [vmem:[%s4363_s1 + $0x74] ss:$8 sps:$4 sm:$0xff]   ;;  %v2893_v23 = vld [vmem:[%s4365_s3 + $0x60] ss:$16 sps:$4 sm:$0xff]   ;;  %v2878_v35 = vld [vmem:[%s4365_s3 + $0x28] ss:$16 sps:$4 sm:$0xff]  }
   0xa   :  { %592 = vmatpush1.bf16.msra.mxu1 %v2881_v15  ;;  %v2894_v24 = vld [vmem:[%s4365_s3 + $0x84] ss:$16 sps:$4 sm:$0xff]   ;;  %v2899_v28 = vld [vmem:[%s4365_s3 + $0x80] ss:$16 sps:$4 sm:$0xff]   ;;  %v2880_v32 = vld [vmem:[%s4365_s3 + $0x2c] ss:$16 sps:$4 sm:$0xff]  }
   0xb   :  { %143 = vmatpush1.bf16.msra.mxu0 %v2854_v6  ;;  %593 = vmatprep.subr.bf16.mxu1 %v2882_v16  ;;  %v28_v26 = vld [vmem:[%s4362_s0] sm:$0xff]  ;;  %v2886_v36 = vld [vmem:[%s4365_s3 + $0x4c] ss:$16 sps:$4 sm:$0xff]   ;;  %v2884_v39 = vld [vmem:[%s4365_s3 + $0x48] ss:$16 sps:$4 sm:$0xff]  }
   0xc   :  { %144 = vmatprep.subr.bf16.mxu0 %v2855_v7  ;;  %v2900_v29 = vld [vmem:[%s4365_s3 + $0xa4] ss:$16 sps:$4 sm:$0xff]   ;;  %v29_v30 = vpack.c.bf16 %v28_v26, %v28_v26  ;;  %v2905_v33 = vld [vmem:[%s4365_s3 + $0xa0] ss:$16 sps:$4 sm:$0xff]   ;;  %v2892_v40 = vld [vmem:[%s4365_s3 + $0x6c] ss:$16 sps:$4 sm:$0xff]  }
   0xd   :  { %v2906_v34 = vld [vmem:[%s4365_s3 + $0xc4] ss:$16 sps:$4 sm:$0xff]   ;;  %v2911_v37 = vld [vmem:[%s4365_s3 + $0xc0] ss:$16 sps:$4 sm:$0xff]   ;;  %v2890_v43 = vld [vmem:[%s4365_s3 + $0x68] ss:$16 sps:$4 sm:$0xff]  }
   0xe   :  { %594 = vmatpush1.bf16.msra.mxu1 %v2887_v19  ;;  %v2912_v38 = vld [vmem:[%s4365_s3 + $0xe4] ss:$16 sps:$4 sm:$0xff]   ;;  %v2917_v41 = vld [vmem:[%s4365_s3 + $0xe0] ss:$16 sps:$4 sm:$0xff]   ;;  %v2898_v44 = vld [vmem:[%s4365_s3 + $0x8c] ss:$16 sps:$4 sm:$0xff]  }
   0xf   :  { %145 = vmatpush1.bf16.msra.mxu0 %v2857_v8  ;;  %595 = vmatprep.subr.bf16.mxu1 %v2888_v20  ;;  %v2918_v42 = vld [vmem:[%s4365_s3 + $0x104] ss:$16 sps:$4 sm:$0xff]   ;;  %v2923_v45 = vld [vmem:[%s4365_s3 + $0x100] ss:$16 sps:$4 sm:$0xff]   ;;  %v2896_v47 = vld [vmem:[%s4365_s3 + $0x88] ss:$16 sps:$4 sm:$0xff]  }
  0x10   :  { %146 = vmatprep.subr.bf16.mxu0 %v2858_v10  ;;  %v2924_v46 = vld [vmem:[%s4365_s3 + $0x124] ss:$16 sps:$4 sm:$0xff]   ;;  %v2929_v48 = vld [vmem:[%s4365_s3 + $0x120] ss:$16 sps:$4 sm:$0xff]   ;;  %v2904_v49 = vld [vmem:[%s4365_s3 + $0xac] ss:$16 sps:$4 sm:$0xff]  }
  0x11   :  { %v2930_v50 = vld [vmem:[%s4365_s3 + $0x144] ss:$16 sps:$4 sm:$0xff]   ;;  %v2902_v51 = vld [vmem:[%s4365_s3 + $0xa8] ss:$16 sps:$4 sm:$0xff]   ;;  %v2935_v52 = vld [vmem:[%s4365_s3 + $0x140] ss:$16 sps:$4 sm:$0xff]  }
  0x12   :  { %596 = vmatpush1.bf16.msra.mxu1 %v2893_v23  ;;  %v2910_v53 = vld [vmem:[%s4365_s3 + $0xcc] ss:$16 sps:$4 sm:$0xff]   ;;  %v2936_v54 = vld [vmem:[%s4365_s3 + $0x164] ss:$16 sps:$4 sm:$0xff]   ;;  %v2908_v55 = vld [vmem:[%s4365_s3 + $0xc8] ss:$16 sps:$4 sm:$0xff]  }
  0x13   :  { %147 = vmatpush1.bf16.msra.mxu0 %v2860_v13  ;;  %597 = vmatprep.subr.bf16.mxu1 %v2894_v24  ;;  %v2941_v56 = vld [vmem:[%s4365_s3 + $0x160] ss:$16 sps:$4 sm:$0xff]   ;;  %v2916_v57 = vld [vmem:[%s4365_s3 + $0xec] ss:$16 sps:$4 sm:$0xff]   ;;  %v2942_v58 = vld [vmem:[%s4365_s3 + $0x184] ss:$16 sps:$4 sm:$0xff]  }
  0x14   :  { %148 = vmatprep.subr.bf16.mxu0 %v2861_v14  ;;  %v2914_v59 = vld [vmem:[%s4365_s3 + $0xe8] ss:$16 sps:$4 sm:$0xff]   ;;  %v2947_v60 = vld [vmem:[%s4365_s3 + $0x180] ss:$16 sps:$4 sm:$0xff]   ;;  %v2922_v61 = vld [vmem:[%s4365_s3 + $0x10c] ss:$16 sps:$4 sm:$0xff]  }
  0x15   :  { %v2948_v62 = vld [vmem:[%s4365_s3 + $0x1a4] ss:$16 sps:$4 sm:$0xff]   ;;  %v2920_v63 = vld [vmem:[%s4365_s3 + $0x108] ss:$16 sps:$4 sm:$0xff]   ;;  %v2953_v0 = vld [vmem:[%s4365_s3 + $0x1a0] ss:$16 sps:$4 sm:$0xff]  }
  0x16   :  { %598 = vmatpush1.bf16.msra.mxu1 %v2899_v28  ;;  %v2928_v1 = vld [vmem:[%s4365_s3 + $0x12c] ss:$16 sps:$4 sm:$0xff]   ;;  %v2926_v2 = vld [vmem:[%s4365_s3 + $0x128] ss:$16 sps:$4 sm:$0xff]   ;;  %v2954_v11 = vld [vmem:[%s4365_s3 + $0x1c4] ss:$16 sps:$4 sm:$0xff]  }
  0x17   :  { %149 = vmatpush1.bf16.msra.mxu0 %v2863_v17  ;;  %599 = vmatprep.subr.bf16.mxu1 %v2900_v29  ;;  %v2934_v3 = vld [vmem:[%s4365_s3 + $0x14c] ss:$16 sps:$4 sm:$0xff]   ;;  %v2932_v4 = vld [vmem:[%s4365_s3 + $0x148] ss:$16 sps:$4 sm:$0xff]   ;;  %v2959_v14 = vld [vmem:[%s4365_s3 + $0x1c0] ss:$16 sps:$4 sm:$0xff]  }
  0x18   :  { %150 = vmatprep.subr.bf16.mxu0 %v2864_v18  ;;  %v2940_v5 = vld [vmem:[%s4365_s3 + $0x16c] ss:$16 sps:$4 sm:$0xff]   ;;  %v2938_v6 = vld [vmem:[%s4365_s3 + $0x168] ss:$16 sps:$4 sm:$0xff]   ;;  %v2960_v15 = vld [vmem:[%s4365_s3 + $0x1e4] ss:$16 sps:$4 sm:$0xff]  }
  0x19   :  { %v2946_v7 = vld [vmem:[%s4365_s3 + $0x18c] ss:$16 sps:$4 sm:$0xff]   ;;  %v2944_v8 = vld [vmem:[%s4365_s3 + $0x188] ss:$16 sps:$4 sm:$0xff]   ;;  %v2965_v18 = vld [vmem:[%s4365_s3 + $0x1e0] ss:$16 sps:$4 sm:$0xff]  }
  0x1a   :  { %600 = vmatpush1.bf16.msra.mxu1 %v2905_v33  ;;  %v2952_v9 = vld [vmem:[%s4365_s3 + $0x1ac] ss:$16 sps:$4 sm:$0xff]   ;;  %v2950_v10 = vld [vmem:[%s4365_s3 + $0x1a8] ss:$16 sps:$4 sm:$0xff]   ;;  %v2968_v19 = vld [vmem:[%s4367_s5 + $0x4] ss:$28 sps:$4 sm:$0xff]  }
  0x1b   :  { %151 = vmatpush1.bf16.msra.mxu0 %v2866_v21  ;;  %601 = vmatprep.subr.bf16.mxu1 %v2906_v34  ;;  %v2958_v12 = vld [vmem:[%s4365_s3 + $0x1cc] ss:$16 sps:$4 sm:$0xff]   ;;  %v2956_v13 = vld [vmem:[%s4365_s3 + $0x1c8] ss:$16 sps:$4 sm:$0xff]  }
  0x1c   :  { %152 = vmatprep.subr.bf16.mxu0 %v2867_v22  ;;  %v2964_v16 = vld [vmem:[%s4365_s3 + $0x1ec] ss:$16 sps:$4 sm:$0xff]   ;;  %v2962_v17 = vld [vmem:[%s4365_s3 + $0x1e8] ss:$16 sps:$4 sm:$0xff]  }
  0x1d   :  { %v2971_v20 = vld [vmem:[%s4367_s5 + $0xc] ss:$28 sps:$4 sm:$0xff]  }
  0x1e   :  { %602 = vmatpush1.bf16.msra.mxu1 %v2911_v37 }
  0x1f   :  { %153 = vmatpush1.bf16.msra.mxu0 %v2869_v25  ;;  %603 = vmatprep.subr.bf16.mxu1 %v2912_v38 }
  0x20   :  { %630 = vmatprep.subr.bf16.mxu0 %v2874_v27 }
  0x22   :  { %171 = vmatmul.mubr.bf16.vlgmr.msra.gmra.mrb[0].mxu0 %v29_v30  ;;  %604 = vmatpush1.bf16.msra.mxu1 %v2917_v41 }
  0x23   :  { %631 = vmatpush1.bf16.msra.mxu0 %v2872_v31  ;;  %605 = vmatprep.subr.bf16.mxu1 %v2918_v42 }
  0x24   :  { %632 = vmatprep.subr.bf16.mxu0 %v2880_v32 }
  0x26   :  { %606 = vmatpush1.bf16.msra.mxu1 %v2923_v45 }
  0x27   :  { %633 = vmatpush1.bf16.msra.mxu0 %v2878_v35  ;;  %607 = vmatprep.subr.bf16.mxu1 %v2924_v46 }
  0x28   :  { %634 = vmatprep.subr.bf16.mxu0 %v2886_v36 }
  0x2a   :  { %608 = vmatpush1.bf16.msra.mxu1 %v2929_v48 }
  0x2b   :  { %635 = vmatpush1.bf16.msra.mxu0 %v2884_v39  ;;  %609 = vmatprep.subr.bf16.mxu1 %v2930_v50 }
  0x2c   :  { %636 = vmatprep.subr.bf16.mxu0 %v2892_v40 }
  0x2e   :  { %610 = vmatpush1.bf16.msra.mxu1 %v2935_v52 }
  0x2f   :  { %637 = vmatpush1.bf16.msra.mxu0 %v2890_v43  ;;  %611 = vmatprep.subr.bf16.mxu1 %v2936_v54 }
  0x30   :  { %638 = vmatprep.subr.bf16.mxu0 %v2898_v44 }
  0x32   :  { %612 = vmatpush1.bf16.msra.mxu1 %v2941_v56 }
  0x33   :  { %639 = vmatpush1.bf16.msra.mxu0 %v2896_v47  ;;  %613 = vmatprep.subr.bf16.mxu1 %v2942_v58 }
  0x34   :  { %640 = vmatprep.subr.bf16.mxu0 %v2904_v49 }
  0x36   :  { %614 = vmatpush1.bf16.msra.mxu1 %v2947_v60 }
  0x37   :  { %641 = vmatpush1.bf16.msra.mxu0 %v2902_v51  ;;  %615 = vmatprep.subr.bf16.mxu1 %v2948_v62 }
  0x38   :  { %642 = vmatprep.subr.bf16.mxu0 %v2910_v53 }
  0x3a   :  { %616 = vmatpush1.bf16.msra.mxu1 %v2953_v0 }
  0x3b   :  { %643 = vmatpush1.bf16.msra.mxu0 %v2908_v55  ;;  %617 = vmatprep.subr.bf16.mxu1 %v2954_v11 }
  0x3c   :  { %644 = vmatprep.subr.bf16.mxu0 %v2916_v57 }
  0x3e   :  { %618 = vmatpush1.bf16.msra.mxu1 %v2959_v14 }
  0x3f   :  { %645 = vmatpush1.bf16.msra.mxu0 %v2914_v59  ;;  %619 = vmatprep.subr.bf16.mxu1 %v2960_v15 }
  0x40   :  { %646 = vmatprep.subr.bf16.mxu0 %v2922_v61 }
  0x42   :  { %620 = vmatpush1.bf16.msra.mxu1 %v2965_v18 }
  0x43   :  { %647 = vmatpush1.bf16.msra.mxu0 %v2920_v63  ;;  %2124 = vmatprep.subr.bf16.mxu1 %v2968_v19 }
  0x44   :  { %648 = vmatprep.subr.bf16.mxu0 %v2928_v1 }
  0x47   :  { %649 = vmatpush1.bf16.msra.mxu0 %v2926_v2 }
  0x48   :  { %650 = vmatprep.subr.bf16.mxu0 %v2934_v3 }
  0x4b   :  { %651 = vmatpush1.bf16.msra.mxu0 %v2932_v4 }
  0x4c   :  { %652 = vmatprep.subr.bf16.mxu0 %v2940_v5 }
  0x4f   :  { %653 = vmatpush1.bf16.msra.mxu0 %v2938_v6 }
  0x50   :  { %654 = vmatprep.subr.bf16.mxu0 %v2946_v7 }
  0x53   :  { %655 = vmatpush1.bf16.msra.mxu0 %v2944_v8 }
  0x54   :  { %656 = vmatprep.subr.bf16.mxu0 %v2952_v9 }
  0x57   :  { %657 = vmatpush1.bf16.msra.mxu0 %v2950_v10 }
  0x58   :  { %658 = vmatprep.subr.bf16.mxu0 %v2958_v12 }
  0x5b   :  { %659 = vmatpush1.bf16.msra.mxu0 %v2956_v13 }
  0x5c   :  { %660 = vmatprep.subr.bf16.mxu0 %v2964_v16 }
  0x5f   :  { %661 = vmatpush1.bf16.msra.mxu0 %v2962_v17 }
  0x60   :  { %2206 = vmatprep.subr.bf16.mxu0 %v2971_v20 }
  0x61   :  { %12 = vsyncpa [#allocation3], 0  ;;  %v48_v21 = vlaneseq  ;;  %v46_v24 = vld [vmem:[%s4364_s2] sm:$0x3]  ;;  %v2969_v38 = vld [vmem:[%s4367_s5 + $0x8] ss:$28 sps:$4 sm:$0xff]  }
  0x62   :  { %v2966_v37 = vld [vmem:[%s4367_s5] ss:$28 sps:$4 sm:$0xff]   ;;  %v2972_v42 = vld [vmem:[%s4367_s5 + $0x38] ss:$28 sps:$4 sm:$0xff]   ;;  %v2978_v46 = vld [vmem:[%s4367_s5 + $0x70] ss:$28 sps:$4 sm:$0xff]  }
  0x63   :  { %v3615_v22 = vshrl.u32 %v48_v21, 7  ;;  %v2974_v40 = vld [vmem:[%s4367_s5 + $0x3c] ss:$28 sps:$4 sm:$0xff]   ;;  %v2977_v41 = vld [vmem:[%s4367_s5 + $0x44] ss:$28 sps:$4 sm:$0xff]  }
  0x64   :  { %v2975_v43 = vld [vmem:[%s4367_s5 + $0x40] ss:$28 sps:$4 sm:$0xff]   ;;  %v2980_v44 = vld [vmem:[%s4367_s5 + $0x74] ss:$28 sps:$4 sm:$0xff]   ;;  %v2986_v48 = vld [vmem:[%s4367_s5 + $0xac] ss:$28 sps:$4 sm:$0xff]  }
  0x65   :  { %v3618_v23 = vsub.s32 0, %v3615_v22  ;;  %v3624_v25 = vsub.s32 1, %v3615_v22  ;;  %v2983_v45 = vld [vmem:[%s4367_s5 + $0x7c] ss:$28 sps:$4 sm:$0xff]   ;;  %v2989_v49 = vld [vmem:[%s4367_s5 + $0xb4] ss:$28 sps:$4 sm:$0xff]  }
  0x66   :  { %v2981_v47 = vld [vmem:[%s4367_s5 + $0x78] ss:$28 sps:$4 sm:$0xff]   ;;  %v2984_v50 = vld [vmem:[%s4367_s5 + $0xa8] ss:$28 sps:$4 sm:$0xff]   ;;  %v2987_v51 = vld [vmem:[%s4367_s5 + $0xb0] ss:$28 sps:$4 sm:$0xff]  }
  0x67   :  { %v51_v26 = vrot.slane %v46_v24, %v3618_v23  ;;  %v55_v27 = vrot.slane %v46_v24, %v3624_v25  ;;  %v2992_v52 = vld [vmem:[%s4367_s5 + $0xe4] ss:$28 sps:$4 sm:$0xff]   ;;  %v2995_v53 = vld [vmem:[%s4367_s5 + $0xec] ss:$28 sps:$4 sm:$0xff]   ;;  %v2998_v56 = vld [vmem:[%s4367_s5 + $0x11c] ss:$28 sps:$4 sm:$0xff]  }
  0x68   :  { %v2990_v54 = vld [vmem:[%s4367_s5 + $0xe0] ss:$28 sps:$4 sm:$0xff]   ;;  %v2993_v55 = vld [vmem:[%s4367_s5 + $0xe8] ss:$28 sps:$4 sm:$0xff]   ;;  %v2996_v58 = vld [vmem:[%s4367_s5 + $0x118] ss:$28 sps:$4 sm:$0xff]  }
  0x69   :  { %v3001_v57 = vld [vmem:[%s4367_s5 + $0x124] ss:$28 sps:$4 sm:$0xff]   ;;  %v3004_v60 = vld [vmem:[%s4367_s5 + $0x154] ss:$28 sps:$4 sm:$0xff]   ;;  %v3007_v61 = vld [vmem:[%s4367_s5 + $0x15c] ss:$28 sps:$4 sm:$0xff]  }
  0x6a   :  { %v2999_v59 = vld [vmem:[%s4367_s5 + $0x120] ss:$28 sps:$4 sm:$0xff]   ;;  %v3002_v62 = vld [vmem:[%s4367_s5 + $0x150] ss:$28 sps:$4 sm:$0xff]   ;;  %v3005_v63 = vld [vmem:[%s4367_s5 + $0x158] ss:$28 sps:$4 sm:$0xff]  }
  0x6b   :  { %v3010_v0 = vld [vmem:[%s4367_s5 + $0x18c] ss:$28 sps:$4 sm:$0xff]   ;;  %v3013_v1 = vld [vmem:[%s4367_s5 + $0x194] ss:$28 sps:$4 sm:$0xff]   ;;  %v3016_v4 = vld [vmem:[%s4367_s5 + $0x1c4] ss:$28 sps:$4 sm:$0xff]  }
  0x6c   :  { %v3008_v2 = vld [vmem:[%s4367_s5 + $0x188] ss:$28 sps:$4 sm:$0xff]   ;;  %v3011_v3 = vld [vmem:[%s4367_s5 + $0x190] ss:$28 sps:$4 sm:$0xff]   ;;  %v3014_v6 = vld [vmem:[%s4367_s5 + $0x1c0] ss:$28 sps:$4 sm:$0xff]  }
  0x6d   :  { %v3019_v5 = vld [vmem:[%s4367_s5 + $0x1cc] ss:$28 sps:$4 sm:$0xff]   ;;  %v3022_v8 = vld [vmem:[%s4367_s5 + $0x1fc] ss:$28 sps:$4 sm:$0xff]   ;;  %v3025_v9 = vld [vmem:[%s4367_s5 + $0x204] ss:$28 sps:$4 sm:$0xff]  }
  0x6e   :  { %v3017_v7 = vld [vmem:[%s4367_s5 + $0x1c8] ss:$28 sps:$4 sm:$0xff]   ;;  %v3020_v10 = vld [vmem:[%s4367_s5 + $0x1f8] ss:$28 sps:$4 sm:$0xff]   ;;  %v3023_v11 = vld [vmem:[%s4367_s5 + $0x200] ss:$28 sps:$4 sm:$0xff]  }
  0x6f   :  { %v3028_v12 = vld [vmem:[%s4367_s5 + $0x234] ss:$28 sps:$4 sm:$0xff]   ;;  %v3031_v13 = vld [vmem:[%s4367_s5 + $0x23c] ss:$28 sps:$4 sm:$0xff]   ;;  %v3034_v16 = vld [vmem:[%s4367_s5 + $0x26c] ss:$28 sps:$4 sm:$0xff]  }
  0x70   :  { %v3026_v14 = vld [vmem:[%s4367_s5 + $0x230] ss:$28 sps:$4 sm:$0xff]   ;;  %v3029_v15 = vld [vmem:[%s4367_s5 + $0x238] ss:$28 sps:$4 sm:$0xff]   ;;  %v3032_v18 = vld [vmem:[%s4367_s5 + $0x268] ss:$28 sps:$4 sm:$0xff]  }
  0x71   :  { %v3037_v17 = vld [vmem:[%s4367_s5 + $0x274] ss:$28 sps:$4 sm:$0xff]   ;;  %v3040_v20 = vld [vmem:[%s4367_s5 + $0x2a4] ss:$28 sps:$4 sm:$0xff]   ;;  %v3043_v21 = vld [vmem:[%s4367_s5 + $0x2ac] ss:$28 sps:$4 sm:$0xff]  }
  0x72   :  { %v3035_v19 = vld [vmem:[%s4367_s5 + $0x270] ss:$28 sps:$4 sm:$0xff]   ;;  %v3038_v24 = vld [vmem:[%s4367_s5 + $0x2a0] ss:$28 sps:$4 sm:$0xff]  }
  0xf5   :  { %v172_v28 = vpop.f32.mrb[0].mxu0 }
  0xf6   :  { %v173_v29 = vadd.f32 %v172_v28, %v51_v26  ;;  %v174_v30 = vpop.f32.mrb[1].mxu0  ;;  %v3041_v26 = vld [vmem:[%s4367_s5 + $0x2a8] ss:$28 sps:$4 sm:$0xff]  }
  0xf7   :  { %v175_v31 = vadd.f32 %v174_v30, %v55_v27  ;;  %v176_v32 = vpop.f32.mrb[2].mxu0  ;;  %v3046_v27 = vld [vmem:[%s4367_s5 + $0x2dc] ss:$28 sps:$4 sm:$0xff]   ;;  %v3049_v28 = vld [vmem:[%s4367_s5 + $0x2e4] ss:$28 sps:$4 sm:$0xff]  }
  0xf8   :  { %v179_v33 = vmax.f32 %v173_v29, 0.0  ;;  %v177_v34 = vpop.f32.mrb[3].mxu0  ;;  %v3044_v29 = vld [vmem:[%s4367_s5 + $0x2d8] ss:$28 sps:$4 sm:$0xff]   ;;  %v3047_v30 = vld [vmem:[%s4367_s5 + $0x2e0] ss:$28 sps:$4 sm:$0xff]  }
  0xf9   :  { %v180_v35 = vmax.f32 %v175_v31, 0.0  ;;  %v3052_v31 = vld [vmem:[%s4367_s5 + $0x314] ss:$28 sps:$4 sm:$0xff]   ;;  %v3055_v32 = vld [vmem:[%s4367_s5 + $0x31c] ss:$28 sps:$4 sm:$0xff]  }
  0xfa   :  { %v181_v39 = vpack.c.bf16 %v179_v33, %v179_v33  ;;  %v3050_v33 = vld [vmem:[%s4367_s5 + $0x310] ss:$28 sps:$4 sm:$0xff]   ;;  %v3053_v34 = vld [vmem:[%s4367_s5 + $0x318] ss:$28 sps:$4 sm:$0xff]  }
  0xfb   :  { %v182_v36 = vpack.c.bf16 %v180_v35, %v180_v35  ;;  %v3058_v35 = vld [vmem:[%s4367_s5 + $0x34c] ss:$28 sps:$4 sm:$0xff]  }
  0xfd   :  { %621 = vmatprep.mubr.bf16.mxu1 %v182_v36  ;;  %662 = vmatprep.mubr.bf16.mxu0 %v182_v36  ;;  %v3061_v36 = vld [vmem:[%s4367_s5 + $0x354] ss:$28 sps:$4 sm:$0xff]  }
  0xfe   :  { %622 = vmatmul.mubr.bf16.vlgmr.msra.gmra.mrb[0].mxu1 %v181_v39  ;;  %663 = vmatmul.mubr.bf16.vlgmr.msra.gmra.mrb[4].mxu0 %v181_v39  ;;  %v3064_v39 = vld [vmem:[%s4367_s5 + $0x384] ss:$28 sps:$4 sm:$0xff]  }
  0xff   :  { %2125 = vmatpush1.bf16.msra.mxu1 %v2966_v37  ;;  %2207 = vmatpush1.bf16.msra.mxu0 %v2969_v38  ;;  %v3056_v37 = vld [vmem:[%s4367_s5 + $0x348] ss:$28 sps:$4 sm:$0xff]   ;;  %v3059_v38 = vld [vmem:[%s4367_s5 + $0x350] ss:$28 sps:$4 sm:$0xff]  }
 0x100   :  { %2126 = vmatprep.subr.bf16.mxu1 %v2974_v40  ;;  %2208 = vmatprep.subr.bf16.mxu0 %v2977_v41  ;;  %v3067_v40 = vld [vmem:[%s4367_s5 + $0x38c] ss:$28 sps:$4 sm:$0xff]   ;;  %v3823_v41 = vld [vmem:[%s4366_s4] sm:$0xf] }
 0x103   :  { %2127 = vmatpush1.bf16.msra.mxu1 %v2972_v42  ;;  %2209 = vmatpush1.bf16.msra.mxu0 %v2975_v43  ;;  %v263_v42 = vsub.s32 3, %v3615_v22  ;;  %v252_v43 = vrot.slane %v3823_v41, %v3618_v23 }
 0x104   :  { %2128 = vmatprep.subr.bf16.mxu1 %v2980_v44  ;;  %2210 = vmatprep.subr.bf16.mxu0 %v2983_v45  ;;  %v256_v44 = vrot.slane %v3823_v41, %v3624_v25 }
 0x105   :  { %v264_v45 = vrot.slane %v3823_v41, %v263_v42 }
 0x107   :  { %2129 = vmatpush1.bf16.msra.mxu1 %v2978_v46  ;;  %2211 = vmatpush1.bf16.msra.mxu0 %v2981_v47 }
 0x108   :  { %2130 = vmatprep.subr.bf16.mxu1 %v2986_v48  ;;  %2212 = vmatprep.subr.bf16.mxu0 %v2989_v49 }
 0x10b   :  { %2131 = vmatpush1.bf16.msra.mxu1 %v2984_v50  ;;  %2213 = vmatpush1.bf16.msra.mxu0 %v2987_v51 }
 0x10c   :  { %2132 = vmatprep.subr.bf16.mxu1 %v2992_v52  ;;  %2214 = vmatprep.subr.bf16.mxu0 %v2995_v53 }
 0x10f   :  { %2133 = vmatpush1.bf16.msra.mxu1 %v2990_v54  ;;  %2215 = vmatpush1.bf16.msra.mxu0 %v2993_v55 }
 0x110   :  { %2134 = vmatprep.subr.bf16.mxu1 %v2998_v56  ;;  %2216 = vmatprep.subr.bf16.mxu0 %v3001_v57 }
 0x113   :  { %2135 = vmatpush1.bf16.msra.mxu1 %v2996_v58  ;;  %2217 = vmatpush1.bf16.msra.mxu0 %v2999_v59 }
 0x114   :  { %2136 = vmatprep.subr.bf16.mxu1 %v3004_v60  ;;  %2218 = vmatprep.subr.bf16.mxu0 %v3007_v61  ;;  %v3062_v61 = vld [vmem:[%s4367_s5 + $0x380] ss:$28 sps:$4 sm:$0xff]  }
 0x117   :  { %2137 = vmatpush1.bf16.msra.mxu1 %v3002_v62  ;;  %2219 = vmatpush1.bf16.msra.mxu0 %v3005_v63  ;;  %v3065_v62 = vld [vmem:[%s4367_s5 + $0x388] ss:$28 sps:$4 sm:$0xff]  }
 0x118   :  { %2138 = vmatprep.subr.bf16.mxu1 %v3010_v0  ;;  %2220 = vmatprep.subr.bf16.mxu0 %v3013_v1  ;;  %v3070_v0 = vld [vmem:[%s4367_s5 + $0x3bc] ss:$28 sps:$4 sm:$0xff]   ;;  %v3073_v1 = vld [vmem:[%s4367_s5 + $0x3c4] ss:$28 sps:$4 sm:$0xff]  }
 0x11b   :  { %2139 = vmatpush1.bf16.msra.mxu1 %v3008_v2  ;;  %2221 = vmatpush1.bf16.msra.mxu0 %v3011_v3  ;;  %v3068_v3 = vld [vmem:[%s4367_s5 + $0x3b8] ss:$28 sps:$4 sm:$0xff]  }
 0x11c   :  { %2140 = vmatprep.subr.bf16.mxu1 %v3016_v4  ;;  %2222 = vmatprep.subr.bf16.mxu0 %v3019_v5  ;;  %v3071_v4 = vld [vmem:[%s4367_s5 + $0x3c0] ss:$28 sps:$4 sm:$0xff]   ;;  %v3076_v5 = vld [vmem:[%s4367_s5 + $0x3f4] ss:$28 sps:$4 sm:$0xff]  }
 0x11f   :  { %2141 = vmatpush1.bf16.msra.mxu1 %v3014_v6  ;;  %2223 = vmatpush1.bf16.msra.mxu0 %v3017_v7  ;;  %v3079_v6 = vld [vmem:[%s4367_s5 + $0x3fc] ss:$28 sps:$4 sm:$0xff]   ;;  %v3074_v7 = vld [vmem:[%s4367_s5 + $0x3f0] ss:$28 sps:$4 sm:$0xff]  }
 0x120   :  { %2142 = vmatprep.subr.bf16.mxu1 %v3022_v8  ;;  %2224 = vmatprep.subr.bf16.mxu0 %v3025_v9  ;;  %v3077_v8 = vld [vmem:[%s4367_s5 + $0x3f8] ss:$28 sps:$4 sm:$0xff]   ;;  %v3082_v9 = vld [vmem:[%s4367_s5 + $0x42c] ss:$28 sps:$4 sm:$0xff]  }
 0x123   :  { %2143 = vmatpush1.bf16.msra.mxu1 %v3020_v10  ;;  %2225 = vmatpush1.bf16.msra.mxu0 %v3023_v11  ;;  %v3085_v10 = vld [vmem:[%s4367_s5 + $0x434] ss:$28 sps:$4 sm:$0xff]   ;;  %v3080_v11 = vld [vmem:[%s4367_s5 + $0x428] ss:$28 sps:$4 sm:$0xff]  }
 0x124   :  { %2144 = vmatprep.subr.bf16.mxu1 %v3028_v12  ;;  %2226 = vmatprep.subr.bf16.mxu0 %v3031_v13  ;;  %v3083_v12 = vld [vmem:[%s4367_s5 + $0x430] ss:$28 sps:$4 sm:$0xff]   ;;  %v3088_v13 = vld [vmem:[%s4367_s5 + $0x464] ss:$28 sps:$4 sm:$0xff]  }
 0x127   :  { %2145 = vmatpush1.bf16.msra.mxu1 %v3026_v14  ;;  %2227 = vmatpush1.bf16.msra.mxu0 %v3029_v15  ;;  %v3091_v14 = vld [vmem:[%s4367_s5 + $0x46c] ss:$28 sps:$4 sm:$0xff]   ;;  %v3086_v15 = vld [vmem:[%s4367_s5 + $0x460] ss:$28 sps:$4 sm:$0xff]  }
 0x128   :  { %2146 = vmatprep.subr.bf16.mxu1 %v3034_v16  ;;  %2228 = vmatprep.subr.bf16.mxu0 %v3037_v17  ;;  %v3089_v16 = vld [vmem:[%s4367_s5 + $0x468] ss:$28 sps:$4 sm:$0xff]   ;;  %v3094_v17 = vld [vmem:[%s4367_s5 + $0x49c] ss:$28 sps:$4 sm:$0xff]  }
 0x12b   :  { %2147 = vmatpush1.bf16.msra.mxu1 %v3032_v18  ;;  %2229 = vmatpush1.bf16.msra.mxu0 %v3035_v19  ;;  %v3097_v18 = vld [vmem:[%s4367_s5 + $0x4a4] ss:$28 sps:$4 sm:$0xff]   ;;  %v3092_v19 = vld [vmem:[%s4367_s5 + $0x498] ss:$28 sps:$4 sm:$0xff]  }
 0x12c   :  { %2148 = vmatprep.subr.bf16.mxu1 %v3040_v20  ;;  %2230 = vmatprep.subr.bf16.mxu0 %v3043_v21  ;;  %v3095_v20 = vld [vmem:[%s4367_s5 + $0x4a0] ss:$28 sps:$4 sm:$0xff]   ;;  %v3100_v21 = vld [vmem:[%s4367_s5 + $0x4d4] ss:$28 sps:$4 sm:$0xff]  }
 0x12f   :  { %2149 = vmatpush1.bf16.msra.mxu1 %v3038_v24  ;;  %2231 = vmatpush1.bf16.msra.mxu0 %v3041_v26  ;;  %v3103_v24 = vld [vmem:[%s4367_s5 + $0x4dc] ss:$28 sps:$4 sm:$0xff]   ;;  %v3098_v26 = vld [vmem:[%s4367_s5 + $0x4d0] ss:$28 sps:$4 sm:$0xff]  }
 0x130   :  { %2150 = vmatprep.subr.bf16.mxu1 %v3046_v27  ;;  %2232 = vmatprep.subr.bf16.mxu0 %v3049_v28  ;;  %v3101_v27 = vld [vmem:[%s4367_s5 + $0x4d8] ss:$28 sps:$4 sm:$0xff]   ;;  %v3106_v28 = vld [vmem:[%s4367_s5 + $0x50c] ss:$28 sps:$4 sm:$0xff]  }
 0x133   :  { %2151 = vmatpush1.bf16.msra.mxu1 %v3044_v29  ;;  %2233 = vmatpush1.bf16.msra.mxu0 %v3047_v30  ;;  %v3109_v29 = vld [vmem:[%s4367_s5 + $0x514] ss:$28 sps:$4 sm:$0xff]   ;;  %v3104_v30 = vld [vmem:[%s4367_s5 + $0x508] ss:$28 sps:$4 sm:$0xff]  }
 0x134   :  { %2152 = vmatprep.subr.bf16.mxu1 %v3052_v31  ;;  %2234 = vmatprep.subr.bf16.mxu0 %v3055_v32  ;;  %v3107_v31 = vld [vmem:[%s4367_s5 + $0x510] ss:$28 sps:$4 sm:$0xff]   ;;  %v3112_v32 = vld [vmem:[%s4367_s5 + $0x544] ss:$28 sps:$4 sm:$0xff]  }
 0x137   :  { %2153 = vmatpush1.bf16.msra.mxu1 %v3050_v33  ;;  %2235 = vmatpush1.bf16.msra.mxu0 %v3053_v34  ;;  %v3115_v33 = vld [vmem:[%s4367_s5 + $0x54c] ss:$28 sps:$4 sm:$0xff]   ;;  %v3110_v34 = vld [vmem:[%s4367_s5 + $0x540] ss:$28 sps:$4 sm:$0xff]  }
 0x138   :  { %2154 = vmatprep.subr.bf16.mxu1 %v3058_v35  ;;  %2236 = vmatprep.subr.bf16.mxu0 %v3061_v36  ;;  %v3113_v35 = vld [vmem:[%s4367_s5 + $0x548] ss:$28 sps:$4 sm:$0xff]   ;;  %v3118_v36 = vld [vmem:[%s4367_s5 + $0x57c] ss:$28 sps:$4 sm:$0xff]  }
 0x13b   :  { %2155 = vmatpush1.bf16.msra.mxu1 %v3056_v37  ;;  %2237 = vmatpush1.bf16.msra.mxu0 %v3059_v38  ;;  %v3121_v37 = vld [vmem:[%s4367_s5 + $0x584] ss:$28 sps:$4 sm:$0xff]   ;;  %v3116_v38 = vld [vmem:[%s4367_s5 + $0x578] ss:$28 sps:$4 sm:$0xff]  }
 0x13c   :  { %2165 = vmatprep.subr.bf16.mxu1 %v3064_v39  ;;  %2247 = vmatprep.subr.bf16.mxu0 %v3067_v40  ;;  %v3119_v39 = vld [vmem:[%s4367_s5 + $0x580] ss:$28 sps:$4 sm:$0xff]   ;;  %v3124_v40 = vld [vmem:[%s4367_s5 + $0x5b4] ss:$28 sps:$4 sm:$0xff]  }
 0x1d1   :  { %v623_v46 = vpop.f32.mrb[0].mxu1  ;;  %v3833_v47 = vpop.f32.mrb[4].mxu0 }
 0x1d2   :  { %v624_v48 = vadd.f32 %v623_v46, %v252_v43  ;;  %v625_v49 = vpop.f32.mrb[1].mxu1  ;;  %v666_v50 = vpop.f32.mrb[5].mxu0  ;;  %v3127_v43 = vld [vmem:[%s4367_s5 + $0x5bc] ss:$28 sps:$4 sm:$0xff]   ;;  %v3130_v46 = vld [vmem:[%s4367_s5 + $0x5ec] ss:$28 sps:$4 sm:$0xff]  }
 0x1d3   :  { %v626_v51 = vadd.f32 %v625_v49, %v256_v44  ;;  %v667_v52 = vadd.f32 %v666_v50, %v264_v45  ;;  %v627_v53 = vpop.f32.mrb[2].mxu1  ;;  %v668_v54 = vpop.f32.mrb[6].mxu0  ;;  %v3122_v44 = vld [vmem:[%s4367_s5 + $0x5b0] ss:$28 sps:$4 sm:$0xff]   ;;  %v3125_v45 = vld [vmem:[%s4367_s5 + $0x5b8] ss:$28 sps:$4 sm:$0xff]  }
 0x1d4   :  { %v671_v55 = vmax.f32 %v624_v48, 0.0  ;;  %v628_v56 = vpop.f32.mrb[3].mxu1  ;;  %v669_v57 = vpop.f32.mrb[7].mxu0  ;;  %v3133_v48 = vld [vmem:[%s4367_s5 + $0x5f4] ss:$28 sps:$4 sm:$0xff]  }
 0x1d5   :  { %v672_v58 = vmax.f32 %v626_v51, 0.0  ;;  %v674_v59 = vmax.f32 %v667_v52, 0.0  ;;  %v3128_v49 = vld [vmem:[%s4367_s5 + $0x5e8] ss:$28 sps:$4 sm:$0xff]   ;;  %v3131_v50 = vld [vmem:[%s4367_s5 + $0x5f0] ss:$28 sps:$4 sm:$0xff]  }
 0x1d6   :  { %v3843_v63 = vpack.c.bf16 %v671_v55, %v671_v55  ;;  %v3136_v51 = vld [vmem:[%s4367_s5 + $0x624] ss:$28 sps:$4 sm:$0xff]   ;;  %v3139_v52 = vld [vmem:[%s4367_s5 + $0x62c] ss:$28 sps:$4 sm:$0xff]   ;;  %v259_v55 = vsub.s32 2, %v3615_v22 }
 0x1d7   :  { %v3835_v60 = vpack.c.bf16 %v672_v58, %v672_v58  ;;  %v3853_v2 = vpack.c.bf16 %v674_v59, %v674_v59  ;;  %v3134_v53 = vld [vmem:[%s4367_s5 + $0x620] ss:$28 sps:$4 sm:$0xff]   ;;  %v3137_v54 = vld [vmem:[%s4367_s5 + $0x628] ss:$28 sps:$4 sm:$0xff]   ;;  %v3140_v58 = vld [vmem:[%s4367_s5 + $0x658] ss:$28 sps:$4 sm:$0xff]  }
 0x1d8   :  { %v3142_v56 = vld [vmem:[%s4367_s5 + $0x65c] ss:$28 sps:$4 sm:$0xff]   ;;  %v3145_v57 = vld [vmem:[%s4367_s5 + $0x664] ss:$28 sps:$4 sm:$0xff]  }
 0x1d9   :  { %2156 = vmatprep.mubr.bf16.mxu1 %v3835_v60  ;;  %2238 = vmatprep.mubr.bf16.mxu0 %v3835_v60  ;;  %v3143_v59 = vld [vmem:[%s4367_s5 + $0x660] ss:$28 sps:$4 sm:$0xff]  }
 0x1da   :  { %2157 = vmatmul.mubr.bf16.vlgmr.msra.gmra.mrb[4].mxu1 %v3843_v63  ;;  %2239 = vmatmul.mubr.bf16.vlgmr.msra.gmra.mrb[8].mxu0 %v3843_v63 }
 0x1db   :  { %2166 = vmatpush1.bf16.msra.mxu1 %v3062_v61  ;;  %2248 = vmatpush1.bf16.msra.mxu0 %v3065_v62  ;;  %v260_v61 = vrot.slane %v3823_v41, %v259_v55  ;;  %v3148_v62 = vld [vmem:[%s4367_s5 + $0x694] ss:$28 sps:$4 sm:$0xff]  }
 0x1dc   :  { %2197 = vmatprep.mubr.bf16.mxu1 %v3853_v2  ;;  %2279 = vmatprep.mubr.bf16.mxu0 %v3853_v2  ;;  %v3149_v41 = vld [vmem:[%s4367_s5 + $0x698] ss:$28 sps:$4 sm:$0xff]  }
 0x1dd   :  { %2167 = vmatprep.subr.bf16.mxu1 %v3070_v0  ;;  %2249 = vmatprep.subr.bf16.mxu0 %v3073_v1  ;;  %v3151_v0 = vld [vmem:[%s4367_s5 + $0x69c] ss:$28 sps:$4 sm:$0xff]   ;;  %v3146_v1 = vld [vmem:[%s4367_s5 + $0x690] ss:$28 sps:$4 sm:$0xff]  }
 0x1df   :  { %2168 = vmatpush1.bf16.msra.mxu1 %v3068_v3  ;;  %2250 = vmatpush1.bf16.msra.mxu0 %v3071_v4  ;;  %v665_v3 = vadd.f32 %v3833_v47, %v260_v61  ;;  %v3154_v4 = vld [vmem:[%s4367_s5 + $0x6cc] ss:$28 sps:$4 sm:$0xff]   ;;  %v3216_v61 = vld [vmem:[%s4367_s5 + $0x600] ss:$28 sps:$4 sm:$0xff]  }
 0x1e0   :  { %2169 = vmatprep.subr.bf16.mxu1 %v3076_v5  ;;  %2251 = vmatprep.subr.bf16.mxu0 %v3079_v6  ;;  %v3157_v5 = vld [vmem:[%s4367_s5 + $0x6d4] ss:$28 sps:$4 sm:$0xff]   ;;  %v3152_v6 = vld [vmem:[%s4367_s5 + $0x6c8] ss:$28 sps:$4 sm:$0xff]  }
 0x1e1   :  { %v3155_v47 = vld [vmem:[%s4367_s5 + $0x6d0] ss:$28 sps:$4 sm:$0xff]  }
 0x1e3   :  { %2170 = vmatpush1.bf16.msra.mxu1 %v3074_v7  ;;  %2252 = vmatpush1.bf16.msra.mxu0 %v3077_v8  ;;  %v673_v7 = vmax.f32 %v665_v3, 0.0  ;;  %v3160_v8 = vld [vmem:[%s4367_s5 + $0x14] ss:$28 sps:$4 sm:$0xff]  }
 0x1e4   :  { %2171 = vmatprep.subr.bf16.mxu1 %v3082_v9  ;;  %2253 = vmatprep.subr.bf16.mxu0 %v3085_v10  ;;  %v3161_v9 = vld [vmem:[%s4367_s5 + $0x1d8] ss:$28 sps:$4 sm:$0xff]   ;;  %v3158_v10 = vld [vmem:[%s4367_s5 + $0x10] ss:$28 sps:$4 sm:$0xff]  }
 0x1e5   :  { %v3218_v3 = vld [vmem:[%s4367_s5 + $0x2b0] ss:$28 sps:$4 sm:$0xff]  }
 0x1e7   :  { %2172 = vmatpush1.bf16.msra.mxu1 %v3080_v11  ;;  %2254 = vmatpush1.bf16.msra.mxu0 %v3083_v12  ;;  %v4047_v11 = vpack.c.bf16 %v673_v7, %v673_v7  ;;  %v3162_v12 = vld [vmem:[%s4367_s5 + $0x18] ss:$28 sps:$4 sm:$0xff]   ;;  %v3227_v7 = vld [vmem:[%s4367_s5 + $0x4b0] ss:$28 sps:$4 sm:$0xff]  }
 0x1e8   :  { %2173 = vmatprep.subr.bf16.mxu1 %v3088_v13  ;;  %2255 = vmatprep.subr.bf16.mxu0 %v3091_v14  ;;  %v3165_v13 = vld [vmem:[%s4367_s5 + $0x4c] ss:$28 sps:$4 sm:$0xff]  }
 0x1e9   :  { %v3166_v14 = vld [vmem:[%s4367_s5 + $0x210] ss:$28 sps:$4 sm:$0xff]  }
 0x1eb   :  { %2174 = vmatpush1.bf16.msra.mxu1 %v3086_v15  ;;  %2256 = vmatpush1.bf16.msra.mxu0 %v3089_v16  ;;  %v3163_v15 = vld [vmem:[%s4367_s5 + $0x48] ss:$28 sps:$4 sm:$0xff]   ;;  %v3167_v16 = vld [vmem:[%s4367_s5 + $0x50] ss:$28 sps:$4 sm:$0xff]  }
 0x1ec   :  { %2175 = vmatprep.subr.bf16.mxu1 %v3094_v17  ;;  %2257 = vmatprep.subr.bf16.mxu0 %v3097_v18  ;;  %v3170_v17 = vld [vmem:[%s4367_s5 + $0x84] ss:$28 sps:$4 sm:$0xff]  }
 0x1ed   :  { %v3171_v18 = vld [vmem:[%s4367_s5 + $0x248] ss:$28 sps:$4 sm:$0xff]  }
 0x1ef   :  { %2176 = vmatpush1.bf16.msra.mxu1 %v3092_v19  ;;  %2258 = vmatpush1.bf16.msra.mxu0 %v3095_v20  ;;  %v3168_v19 = vld [vmem:[%s4367_s5 + $0x80] ss:$28 sps:$4 sm:$0xff]  }
 0x1f0   :  { %2177 = vmatprep.subr.bf16.mxu1 %v3100_v21  ;;  %2259 = vmatprep.subr.bf16.mxu0 %v3103_v24  ;;  %v3175_v20 = vld [vmem:[%s4367_s5 + $0xbc] ss:$28 sps:$4 sm:$0xff]  }
 0x1f1   :  { %v3176_v21 = vld [vmem:[%s4367_s5 + $0x280] ss:$28 sps:$4 sm:$0xff]   ;;  %v3173_v24 = vld [vmem:[%s4367_s5 + $0xb8] ss:$28 sps:$4 sm:$0xff]  }
 0x1f3   :  { %2178 = vmatpush1.bf16.msra.mxu1 %v3098_v26  ;;  %2260 = vmatpush1.bf16.msra.mxu0 %v3101_v27  ;;  %v3177_v26 = vld [vmem:[%s4367_s5 + $0xc0] ss:$28 sps:$4 sm:$0xff]   ;;  %v3180_v27 = vld [vmem:[%s4367_s5 + $0xf4] ss:$28 sps:$4 sm:$0xff]  }
 0x1f4   :  { %2179 = vmatprep.subr.bf16.mxu1 %v3106_v28  ;;  %2261 = vmatprep.subr.bf16.mxu0 %v3109_v29  ;;  %v3181_v28 = vld [vmem:[%s4367_s5 + $0x2b8] ss:$28 sps:$4 sm:$0xff]   ;;  %v3178_v29 = vld [vmem:[%s4367_s5 + $0xf0] ss:$28 sps:$4 sm:$0xff]  }
 0x1f7   :  { %2180 = vmatpush1.bf16.msra.mxu1 %v3104_v30  ;;  %2262 = vmatpush1.bf16.msra.mxu0 %v3107_v31  ;;  %v3182_v30 = vld [vmem:[%s4367_s5 + $0xf8] ss:$28 sps:$4 sm:$0xff]   ;;  %v3185_v31 = vld [vmem:[%s4367_s5 + $0x12c] ss:$28 sps:$4 sm:$0xff]  }
 0x1f8   :  { %2181 = vmatprep.subr.bf16.mxu1 %v3112_v32  ;;  %2263 = vmatprep.subr.bf16.mxu0 %v3115_v33  ;;  %v3186_v32 = vld [vmem:[%s4367_s5 + $0x2f0] ss:$28 sps:$4 sm:$0xff]   ;;  %v3183_v33 = vld [vmem:[%s4367_s5 + $0x128] ss:$28 sps:$4 sm:$0xff]  }
 0x1fb   :  { %2182 = vmatpush1.bf16.msra.mxu1 %v3110_v34  ;;  %2264 = vmatpush1.bf16.msra.mxu0 %v3113_v35  ;;  %v3187_v34 = vld [vmem:[%s4367_s5 + $0x130] ss:$28 sps:$4 sm:$0xff]   ;;  %v3190_v35 = vld [vmem:[%s4367_s5 + $0x164] ss:$28 sps:$4 sm:$0xff]  }
 0x1fc   :  { %2183 = vmatprep.subr.bf16.mxu1 %v3118_v36  ;;  %2265 = vmatprep.subr.bf16.mxu0 %v3121_v37  ;;  %v3191_v36 = vld [vmem:[%s4367_s5 + $0x328] ss:$28 sps:$4 sm:$0xff]   ;;  %v3188_v37 = vld [vmem:[%s4367_s5 + $0x160] ss:$28 sps:$4 sm:$0xff]  }
 0x1ff   :  { %2184 = vmatpush1.bf16.msra.mxu1 %v3116_v38  ;;  %2266 = vmatpush1.bf16.msra.mxu0 %v3119_v39  ;;  %v3192_v38 = vld [vmem:[%s4367_s5 + $0x168] ss:$28 sps:$4 sm:$0xff]   ;;  %v3195_v39 = vld [vmem:[%s4367_s5 + $0x19c] ss:$28 sps:$4 sm:$0xff]  }
 0x200   :  { %2185 = vmatprep.subr.bf16.mxu1 %v3124_v40  ;;  %2267 = vmatprep.subr.bf16.mxu0 %v3127_v43  ;;  %v3196_v40 = vld [vmem:[%s4367_s5 + $0x360] ss:$28 sps:$4 sm:$0xff]   ;;  %v3193_v43 = vld [vmem:[%s4367_s5 + $0x198] ss:$28 sps:$4 sm:$0xff]  }
 0x203   :  { %2186 = vmatpush1.bf16.msra.mxu1 %v3122_v44  ;;  %2268 = vmatpush1.bf16.msra.mxu0 %v3125_v45  ;;  %v3197_v44 = vld [vmem:[%s4367_s5 + $0x1a0] ss:$28 sps:$4 sm:$0xff]   ;;  %v3200_v45 = vld [vmem:[%s4367_s5 + $0x1d4] ss:$28 sps:$4 sm:$0xff]  }
 0x204   :  { %2187 = vmatprep.subr.bf16.mxu1 %v3130_v46  ;;  %2269 = vmatprep.subr.bf16.mxu0 %v3133_v48  ;;  %v3201_v46 = vld [vmem:[%s4367_s5 + $0x558] ss:$28 sps:$4 sm:$0xff]   ;;  %v3198_v48 = vld [vmem:[%s4367_s5 + $0x1d0] ss:$28 sps:$4 sm:$0xff]  }
 0x207   :  { %2188 = vmatpush1.bf16.msra.mxu1 %v3128_v49  ;;  %2270 = vmatpush1.bf16.msra.mxu0 %v3131_v50  ;;  %v3202_v49 = vld [vmem:[%s4367_s5 + $0x398] ss:$28 sps:$4 sm:$0xff]   ;;  %v3205_v50 = vld [vmem:[%s4367_s5 + $0x20c] ss:$28 sps:$4 sm:$0xff]  }
 0x208   :  { %2189 = vmatprep.subr.bf16.mxu1 %v3136_v51  ;;  %2271 = vmatprep.subr.bf16.mxu0 %v3139_v52  ;;  %v3206_v51 = vld [vmem:[%s4367_s5 + $0x590] ss:$28 sps:$4 sm:$0xff]   ;;  %v3203_v52 = vld [vmem:[%s4367_s5 + $0x208] ss:$28 sps:$4 sm:$0xff]  }
 0x20b   :  { %2190 = vmatpush1.bf16.msra.mxu1 %v3134_v53  ;;  %2272 = vmatpush1.bf16.msra.mxu0 %v3137_v54  ;;  %v3207_v53 = vld [vmem:[%s4367_s5 + $0x3d0] ss:$28 sps:$4 sm:$0xff]   ;;  %v3210_v54 = vld [vmem:[%s4367_s5 + $0x244] ss:$28 sps:$4 sm:$0xff]  }
 0x20c   :  { %2191 = vmatprep.subr.bf16.mxu1 %v3142_v56  ;;  %2273 = vmatprep.subr.bf16.mxu0 %v3145_v57  ;;  %v3211_v56 = vld [vmem:[%s4367_s5 + $0x5c8] ss:$28 sps:$4 sm:$0xff]   ;;  %v3208_v57 = vld [vmem:[%s4367_s5 + $0x240] ss:$28 sps:$4 sm:$0xff]  }
 0x20f   :  { %2192 = vmatpush1.bf16.msra.mxu1 %v3140_v58  ;;  %2274 = vmatpush1.bf16.msra.mxu0 %v3143_v59  ;;  %v3212_v58 = vld [vmem:[%s4367_s5 + $0x408] ss:$28 sps:$4 sm:$0xff]   ;;  %v3215_v59 = vld [vmem:[%s4367_s5 + $0x27c] ss:$28 sps:$4 sm:$0xff]  }
 0x210   :  { %2193 = vmatprep.subr.bf16.mxu1 %v3148_v62  ;;  %2275 = vmatprep.subr.bf16.mxu0 %v3151_v0  ;;  %v3213_v62 = vld [vmem:[%s4367_s5 + $0x278] ss:$28 sps:$4 sm:$0xff]   ;;  %v3217_v0 = vld [vmem:[%s4367_s5 + $0x440] ss:$28 sps:$4 sm:$0xff]  }
 0x213   :  { %2194 = vmatpush1.bf16.msra.mxu1 %v3146_v1  ;;  %2276 = vmatpush1.bf16.msra.mxu0 %v3149_v41  ;;  %v3220_v1 = vld [vmem:[%s4367_s5 + $0x2b4] ss:$28 sps:$4 sm:$0xff]  }
 0x214   :  { %2195 = vmatprep.subr.bf16.mxu1 %v3154_v4  ;;  %2277 = vmatprep.subr.bf16.mxu0 %v3157_v5  ;;  %v3221_v41 = vld [vmem:[%s4367_s5 + $0x638] ss:$28 sps:$4 sm:$0xff]   ;;  %v3225_v5 = vld [vmem:[%s4367_s5 + $0x2ec] ss:$28 sps:$4 sm:$0xff]  }
 0x215   :  { %v3222_v4 = vld [vmem:[%s4367_s5 + $0x478] ss:$28 sps:$4 sm:$0xff]  }
 0x217   :  { %2196 = vmatpush1.bf16.msra.mxu1 %v3152_v6  ;;  %2278 = vmatpush1.bf16.msra.mxu0 %v3155_v47  ;;  %v3226_v6 = vld [vmem:[%s4367_s5 + $0x670] ss:$28 sps:$4 sm:$0xff]   ;;  %v3223_v47 = vld [vmem:[%s4367_s5 + $0x2e8] ss:$28 sps:$4 sm:$0xff]  }
 0x218   :  { %2288 = vmatprep.subr.bf16.mxu1 %v3160_v8  ;;  %2782 = vmatprep.subr.bf16.mxu0 %v3161_v9  ;;  %v3230_v8 = vld [vmem:[%s4367_s5 + $0x324] ss:$28 sps:$4 sm:$0xff]  }
 0x219   :  { %v3231_v9 = vld [vmem:[%s4367_s5 + $0x6a8] ss:$28 sps:$4 sm:$0xff]  }
 0x21a   :  { %2198 = vmatmul.mubr.bf16.vlgmr.msra.gmra.mrb[4].mxu1 %v4047_v11  ;;  %2280 = vmatmul.mubr.bf16.vlgmr.msra.gmra.mrb[8].mxu0 %v4047_v11 }
 0x21b   :  { %2289 = vmatpush1.bf16.msra.mxu1 %v3158_v10  ;;  %2320 = vmatprep.mubr.bf16.mxu1 %v3835_v60  ;;  %v3228_v10 = vld [vmem:[%s4367_s5 + $0x320] ss:$28 sps:$4 sm:$0xff]  }
 0x21c   :  { %2783 = vmatpush3.bf16.msra.mxu0 %v3162_v12  ;;  %2402 = vmatprep.mubr.bf16.mxu0 %v3835_v60  ;;  %v3172_v60 = vld [vmem:[%s4367_s5 + $0x88] ss:$28 sps:$4 sm:$0xff]  }
 0x21d   :  { %2290 = vmatprep.subr.bf16.mxu1 %v3165_v13  ;;  %2784 = vmatprep.subr.bf16.mxu0 %v3166_v14  ;;  %v3232_v12 = vld [vmem:[%s4367_s5 + $0x4e8] ss:$28 sps:$4 sm:$0xff]   ;;  %v3235_v13 = vld [vmem:[%s4367_s5 + $0x35c] ss:$28 sps:$4 sm:$0xff]  }
 0x21e   :  { %v3236_v14 = vld [vmem:[%s4367_s5 + $0x6e0] ss:$28 sps:$4 sm:$0xff]  }
 0x21f   :  { %2291 = vmatpush1.bf16.msra.mxu1 %v3163_v15  ;;  %v3233_v15 = vld [vmem:[%s4367_s5 + $0x358] ss:$28 sps:$4 sm:$0xff]  }
 0x220   :  { %2785 = vmatpush3.bf16.msra.mxu0 %v3167_v16  ;;  %2292 = vmatprep.subr.bf16.mxu1 %v3170_v17  ;;  %v3237_v16 = vld [vmem:[%s4367_s5 + $0x520] ss:$28 sps:$4 sm:$0xff]   ;;  %v3240_v17 = vld [vmem:[%s4367_s5 + $0x394] ss:$28 sps:$4 sm:$0xff]  }
 0x221   :  { %2786 = vmatprep.subr.bf16.mxu0 %v3171_v18  ;;  %v3238_v18 = vld [vmem:[%s4367_s5 + $0x390] ss:$28 sps:$4 sm:$0xff]  }
 0x223   :  { %2293 = vmatpush1.bf16.msra.mxu1 %v3168_v19  ;;  %v3243_v19 = vld [vmem:[%s4367_s5 + $0x3cc] ss:$28 sps:$4 sm:$0xff]  }
 0x224   :  { %2787 = vmatpush3.bf16.msra.mxu0 %v3172_v60  ;;  %2294 = vmatprep.subr.bf16.mxu1 %v3175_v20  ;;  %v3241_v60 = vld [vmem:[%s4367_s5 + $0x3c8] ss:$28 sps:$4 sm:$0xff]  }
 0x225   :  { %2788 = vmatprep.subr.bf16.mxu0 %v3176_v21  ;;  %v3246_v20 = vld [vmem:[%s4367_s5 + $0x404] ss:$28 sps:$4 sm:$0xff]  }
 0x226   :  { %v3244_v21 = vld [vmem:[%s4367_s5 + $0x400] ss:$28 sps:$4 sm:$0xff]  }
 0x227   :  { %2295 = vmatpush1.bf16.msra.mxu1 %v3173_v24  ;;  %v3252_v24 = vld [vmem:[%s4367_s5 + $0x474] ss:$28 sps:$4 sm:$0xff]  }
 0x228   :  { %2789 = vmatpush3.bf16.msra.mxu0 %v3177_v26  ;;  %2296 = vmatprep.subr.bf16.mxu1 %v3180_v27  ;;  %v3250_v26 = vld [vmem:[%s4367_s5 + $0x470] ss:$28 sps:$4 sm:$0xff]  }
 0x229   :  { %2790 = vmatprep.subr.bf16.mxu0 %v3181_v28  ;;  %v3255_v27 = vld [vmem:[%s4367_s5 + $0x4ac] ss:$28 sps:$4 sm:$0xff]  }
 0x22a   :  { %v3253_v28 = vld [vmem:[%s4367_s5 + $0x4a8] ss:$28 sps:$4 sm:$0xff]  }
 0x22b   :  { %2297 = vmatpush1.bf16.msra.mxu1 %v3178_v29  ;;  %v3258_v29 = vld [vmem:[%s4367_s5 + $0x4e4] ss:$28 sps:$4 sm:$0xff]  }
 0x22c   :  { %2791 = vmatpush3.bf16.msra.mxu0 %v3182_v30  ;;  %2298 = vmatprep.subr.bf16.mxu1 %v3185_v31  ;;  %v3256_v30 = vld [vmem:[%s4367_s5 + $0x4e0] ss:$28 sps:$4 sm:$0xff]  }
 0x22d   :  { %2792 = vmatprep.subr.bf16.mxu0 %v3186_v32  ;;  %v3261_v31 = vld [vmem:[%s4367_s5 + $0x51c] ss:$28 sps:$4 sm:$0xff]  }
 0x22e   :  { %v3259_v32 = vld [vmem:[%s4367_s5 + $0x518] ss:$28 sps:$4 sm:$0xff]  }
 0x22f   :  { %2299 = vmatpush1.bf16.msra.mxu1 %v3183_v33  ;;  %v3264_v33 = vld [vmem:[%s4367_s5 + $0x554] ss:$28 sps:$4 sm:$0xff]  }
 0x230   :  { %2793 = vmatpush3.bf16.msra.mxu0 %v3187_v34  ;;  %2300 = vmatprep.subr.bf16.mxu1 %v3190_v35  ;;  %v3262_v34 = vld [vmem:[%s4367_s5 + $0x550] ss:$28 sps:$4 sm:$0xff]  }
 0x231   :  { %2794 = vmatprep.subr.bf16.mxu0 %v3191_v36  ;;  %v3267_v35 = vld [vmem:[%s4367_s5 + $0x58c] ss:$28 sps:$4 sm:$0xff]  }
 0x232   :  { %v3265_v36 = vld [vmem:[%s4367_s5 + $0x588] ss:$28 sps:$4 sm:$0xff]  }
 0x233   :  { %2301 = vmatpush1.bf16.msra.mxu1 %v3188_v37  ;;  %v3270_v37 = vld [vmem:[%s4367_s5 + $0x5c4] ss:$28 sps:$4 sm:$0xff]  }
 0x234   :  { %2795 = vmatpush3.bf16.msra.mxu0 %v3192_v38  ;;  %2302 = vmatprep.subr.bf16.mxu1 %v3195_v39  ;;  %v3268_v38 = vld [vmem:[%s4367_s5 + $0x5c0] ss:$28 sps:$4 sm:$0xff]  }
 0x235   :  { %2796 = vmatprep.subr.bf16.mxu0 %v3196_v40  ;;  %v3273_v39 = vld [vmem:[%s4367_s5 + $0x5fc] ss:$28 sps:$4 sm:$0xff]  }
 0x236   :  { %v3271_v40 = vld [vmem:[%s4367_s5 + $0x5f8] ss:$28 sps:$4 sm:$0xff]  }
 0x237   :  { %2303 = vmatpush1.bf16.msra.mxu1 %v3193_v43  ;;  %v3276_v43 = vld [vmem:[%s4367_s5 + $0x634] ss:$28 sps:$4 sm:$0xff]  }
 0x238   :  { %2797 = vmatpush3.bf16.msra.mxu0 %v3197_v44  ;;  %2304 = vmatprep.subr.bf16.mxu1 %v3200_v45  ;;  %v3274_v44 = vld [vmem:[%s4367_s5 + $0x630] ss:$28 sps:$4 sm:$0xff]  }
 0x239   :  { %2804 = vmatprep.subr.bf16.mxu0 %v3201_v46  ;;  %v3279_v45 = vld [vmem:[%s4367_s5 + $0x66c] ss:$28 sps:$4 sm:$0xff]  }
 0x23a   :  { %v3277_v46 = vld [vmem:[%s4367_s5 + $0x668] ss:$28 sps:$4 sm:$0xff]  }
 0x23b   :  { %2403 = vmatmul.mubr.bf16.vlgmr.msra.gmra.mrb[12].mxu0 %v3843_v63  ;;  %2305 = vmatpush1.bf16.msra.mxu1 %v3198_v48  ;;  %v3282_v48 = vld [vmem:[%s4367_s5 + $0x6a4] ss:$28 sps:$4 sm:$0xff]  }
 0x23c   :  { %2805 = vmatpush3.bf16.msra.mxu0 %v3202_v49  ;;  %2442 = vmatprep.mubr.bf16.mxu0 %v3853_v2  ;;  %v3280_v49 = vld [vmem:[%s4367_s5 + $0x6a0] ss:$28 sps:$4 sm:$0xff]  }
 0x23d   :  { %2306 = vmatprep.subr.bf16.mxu1 %v3205_v50  ;;  %2806 = vmatprep.subr.bf16.mxu0 %v3206_v51  ;;  %v3285_v50 = vld [vmem:[%s4367_s5 + $0x6dc] ss:$28 sps:$4 sm:$0xff]  }
 0x23e   :  { %v3283_v51 = vld [vmem:[%s4367_s5 + $0x6d8] ss:$28 sps:$4 sm:$0xff]  }
 0x23f   :  { %2307 = vmatpush1.bf16.msra.mxu1 %v3203_v52  ;;  %v935_v52 = vld [vmem:[%s4368_s6] sm:$0xff] }
 0x240   :  { %2807 = vmatpush3.bf16.msra.mxu0 %v3207_v53  ;;  %2308 = vmatprep.subr.bf16.mxu1 %v3210_v54  ;;  %v940_v53 = vrot.slane %v935_v52, %v3618_v23  ;;  %v948_v54 = vrot.slane %v935_v52, %v259_v55 }
 0x241   :  { %2808 = vmatprep.subr.bf16.mxu0 %v3211_v56  ;;  %v944_v56 = vrot.slane %v935_v52, %v3624_v25 }
 0x243   :  { %2309 = vmatpush1.bf16.msra.mxu1 %v3208_v57  ;;  %v952_v57 = vrot.slane %v935_v52, %v263_v42 }
 0x244   :  { %2809 = vmatpush3.bf16.msra.mxu0 %v3212_v58  ;;  %2310 = vmatprep.subr.bf16.mxu1 %v3215_v59 }
 0x245   :  { %2810 = vmatprep.subr.bf16.mxu0 %v3216_v61 }
 0x247   :  { %2311 = vmatpush1.bf16.msra.mxu1 %v3213_v62 }
 0x248   :  { %2811 = vmatpush3.bf16.msra.mxu0 %v3217_v0  ;;  %2312 = vmatprep.subr.bf16.mxu1 %v3220_v1 }
 0x249   :  { %2812 = vmatprep.subr.bf16.mxu0 %v3221_v41 }
 0x24b   :  { %2313 = vmatpush1.bf16.msra.mxu1 %v3218_v3 }
 0x24c   :  { %2813 = vmatpush3.bf16.msra.mxu0 %v3222_v4  ;;  %2314 = vmatprep.subr.bf16.mxu1 %v3225_v5 }
 0x24d   :  { %2814 = vmatprep.subr.bf16.mxu0 %v3226_v6 }
 0x24f   :  { %2315 = vmatpush1.bf16.msra.mxu1 %v3223_v47 }
 0x250   :  { %2815 = vmatpush3.bf16.msra.mxu0 %v3227_v7  ;;  %2316 = vmatprep.subr.bf16.mxu1 %v3230_v8 }
 0x251   :  { %2816 = vmatprep.subr.bf16.mxu0 %v3231_v9 }
 0x253   :  { %2317 = vmatpush1.bf16.msra.mxu1 %v3228_v10 }
 0x254   :  { %2817 = vmatpush3.bf16.msra.mxu0 %v3232_v12  ;;  %2318 = vmatprep.subr.bf16.mxu1 %v3235_v13  ;;  %v963_v12 = vsub.s32 6, %v3615_v22 }
 0x255   :  { %2818 = vmatprep.subr.bf16.mxu0 %v3236_v14 }
 0x256   :  { %v964_v13 = vrot.slane %v935_v52, %v963_v12 }
 0x257   :  { %2319 = vmatpush1.bf16.msra.mxu1 %v3233_v15 }
 0x258   :  { %2819 = vmatpush3.bf16.msra.mxu0 %v3237_v16  ;;  %2329 = vmatprep.subr.bf16.mxu1 %v3240_v17 }
 0x25a   :  { %2321 = vmatmul.mubr.bf16.vlgmr.msra.gmra.mrb[8].mxu1 %v3843_v63  ;;  %v3249_v63 = vld [vmem:[%s4367_s5 + $0x43c] ss:$28 sps:$4 sm:$0xff]  }
 0x25b   :  { %2443 = vmatmul.mubr.bf16.vlgmr.msra.gmra.mrb[16].mxu0 %v4047_v11  ;;  %2330 = vmatpush1.bf16.msra.mxu1 %v3238_v18 }
 0x25c   :  { %2361 = vmatprep.mubr.bf16.mxu1 %v3853_v2  ;;  %2331 = vmatprep.subr.bf16.mxu1 %v3243_v19  ;;  %v3247_v2 = vld [vmem:[%s4367_s5 + $0x438] ss:$28 sps:$4 sm:$0xff]   ;;  %s3325_s5 = smov [#allocation2]  }
 0x25d   :  { %s2470_s6 = sshll.u32 %s3325_s5, 4  ;;  %s2471_s6 = int_to_ptr.vmem [resolvable:$true] %s2470_s6 }
 0x25e   :  { %s3300_s23 = scalar_lea.vmem %s2471_s6, 896  ;;  %p3305_p1 = scmp.lt.s32.totalorder %s2471_s6, %s2471_s6 }
 0x25f   :  { %2332 = vmatpush1.bf16.msra.mxu1 %v3241_v60  ;;  %p3301_p0 = scmp.ne.s32.totalorder %s2471_s6, %s3300_s23  ;;  %p3306_p2 = scmp.lt.s32.totalorder %s3300_s23, %s3300_s23 }
 0x260   :  { %2333 = vmatprep.subr.bf16.mxu1 %v3246_v20 }
 0x261   :  { %p3307_p3 = por %p3306_p2, %p3305_p1 }
 0x263   :  { %2334 = vmatpush1.bf16.msra.mxu1 %v3244_v21  ;;  %v955_v21 = vsub.s32 4, %v3615_v22  ;;  %p3308_p4 = pnand %p3307_p3, %p3301_p0 }
 0x264   :  { %2335 = vmatprep.subr.bf16.mxu1 %v3249_v63  ;;  %v959_v63 = vsub.s32 5, %v3615_v22 }
 0x267   :  { %2336 = vmatpush1.bf16.msra.mxu1 %v3247_v2  ;;  %v956_v2 = vrot.slane %v935_v52, %v955_v21 }
 0x268   :  { %2337 = vmatprep.subr.bf16.mxu1 %v3252_v24  ;;  %v960_v24 = vrot.slane %v935_v52, %v959_v63 }
 0x26b   :  { %2338 = vmatpush1.bf16.msra.mxu1 %v3250_v26 }
 0x26c   :  { %2339 = vmatprep.subr.bf16.mxu1 %v3255_v27 }
 0x26f   :  { %2340 = vmatpush1.bf16.msra.mxu1 %v3253_v28 }
 0x270   :  { %2341 = vmatprep.subr.bf16.mxu1 %v3258_v29 }
 0x273   :  { %2342 = vmatpush1.bf16.msra.mxu1 %v3256_v30 }
 0x274   :  { %2343 = vmatprep.subr.bf16.mxu1 %v3261_v31 }
 0x277   :  { %2344 = vmatpush1.bf16.msra.mxu1 %v3259_v32 }
 0x278   :  { %2345 = vmatprep.subr.bf16.mxu1 %v3264_v33 }
 0x27b   :  { %2346 = vmatpush1.bf16.msra.mxu1 %v3262_v34 }
 0x27c   :  { %2347 = vmatprep.subr.bf16.mxu1 %v3267_v35 }
 0x27f   :  { %2348 = vmatpush1.bf16.msra.mxu1 %v3265_v36 }
 0x280   :  { %2349 = vmatprep.subr.bf16.mxu1 %v3270_v37 }
 0x283   :  { %2350 = vmatpush1.bf16.msra.mxu1 %v3268_v38 }
 0x284   :  { %2351 = vmatprep.subr.bf16.mxu1 %v3273_v39 }
 0x287   :  { %2352 = vmatpush1.bf16.msra.mxu1 %v3271_v40 }
 0x288   :  { %2353 = vmatprep.subr.bf16.mxu1 %v3276_v43 }
 0x28b   :  { %2354 = vmatpush1.bf16.msra.mxu1 %v3274_v44 }
 0x28c   :  { %2355 = vmatprep.subr.bf16.mxu1 %v3279_v45 }
 0x28f   :  { %2356 = vmatpush1.bf16.msra.mxu1 %v3277_v46 }
 0x290   :  { %2357 = vmatprep.subr.bf16.mxu1 %v3282_v48 }
 0x293   :  { %2358 = vmatpush1.bf16.msra.mxu1 %v3280_v49 }
 0x294   :  { %2359 = vmatprep.subr.bf16.mxu1 %v3285_v50 }
 0x297   :  { %2360 = vmatpush1.bf16.msra.mxu1 %v3283_v51 }
 0x29a   :  { %2362 = vmatmul.mubr.bf16.vlgmr.msra.gmra.mrb[8].mxu1 %v4047_v11 }
 0x2ed   :  { %v2199_v58 = vpop.f32.mrb[4].mxu1  ;;  %v2281_v59 = vpop.f32.mrb[8].mxu0 }
 0x2ee   :  { %v2826_v61 = vadd.f32 %v2199_v58, %v940_v53  ;;  %v2828_v62 = vadd.f32 %v2281_v59, %v948_v54  ;;  %v2201_v0 = vpop.f32.mrb[5].mxu1  ;;  %v2283_v11 = vpop.f32.mrb[9].mxu0 }
 0x2ef   :  { %v2827_v1 = vadd.f32 %v2201_v0, %v944_v56  ;;  %v2829_v41 = vadd.f32 %v2283_v11, %v952_v57  ;;  %v2203_v3 = vpop.f32.mrb[6].mxu1  ;;  %v2285_v4 = vpop.f32.mrb[10].mxu0 }
 0x2f0   :  { %3286 = vtanh.f32 %v2826_v61  ;;  %v2204_v23 = vpop.f32.mrb[7].mxu1  ;;  %v2286_v5 = vpop.f32.mrb[11].mxu0 }
 0x2f1   :  { %3288 = vtanh.f32 %v2828_v62 }
 0x2f2   :  { %3290 = vtanh.f32 %v2827_v1 }
 0x2f3   :  { %3292 = vtanh.f32 %v2829_v41 }
 0x2fa   :  { %v3287_v25 = vpop.eup %3286 }
 0x2fb   :  { %v3289_v55 = vpop.eup %3288  ;;  %2457 = vst [vmem:[#allocation2] sm:$0xff] %v3287_v25 }
 0x2fc   :  { %v3291_v42 = vpop.eup %3290  ;;  %2459 = vst [vmem:[#allocation2 + $0x10] sm:$0xff] %v3289_v55 }
 0x2fd   :  { %v3293_v6 = vpop.eup %3292  ;;  %2458 = vst [vmem:[#allocation2 + $0x8] sm:$0xff] %v3291_v42 }
 0x2fe   :  { %2460 = vst [vmem:[#allocation2 + $0x18] sm:$0xff] %v3293_v6 }
 0x30e   :  { %v2798_v47 = vpop.f32.mrb[12].mxu0 }
 0x30f   :  { %v2799_v7 = vpop.f32.mrb[13].mxu0 }
 0x310   :  { %v2800_v8 = vadd.f32 %v2799_v7, %v2798_v47  ;;  %v2801_v9 = vpop.f32.mrb[14].mxu0 }
 0x311   :  { %v2802_v10 = vpop.f32.mrb[15].mxu0 }
 0x312   :  { %v2405_v16 = vadd.f32 %v2800_v8, %v964_v13 }
 0x32e   :  { %v2820_v14 = vpop.f32.mrb[16].mxu0 }
 0x32f   :  { %v2821_v15 = vpop.f32.mrb[17].mxu0 }
 0x330   :  { %v2822_v17 = vadd.f32 %v2821_v15, %v2820_v14  ;;  %v2823_v18 = vpop.f32.mrb[18].mxu0 }
 0x331   :  { %v2824_v19 = vpop.f32.mrb[19].mxu0 }
 0x332   :  { %v2445_v60 = vadd.f32 %v2822_v17, %v2405_v16 }
 0x334   :  { %3294 = vtanh.f32 %v2445_v60 }
 0x33e   :  { %v3295_v20 = vpop.eup %3294 }
 0x33f   :  { %2463 = vst [vmem:[#allocation2 + $0x30] sm:$0xff] %v3295_v20 }
 0x36d   :  { %v2363_v26 = vpop.f32.mrb[8].mxu1 }
 0x36e   :  { %v2830_v27 = vadd.f32 %v2363_v26, %v956_v2  ;;  %v2365_v28 = vpop.f32.mrb[9].mxu1 }
 0x36f   :  { %v2831_v29 = vadd.f32 %v2365_v28, %v960_v24  ;;  %v2367_v30 = vpop.f32.mrb[10].mxu1 }
 0x370   :  { %3296 = vtanh.f32 %v2830_v27  ;;  %v2368_v31 = vpop.f32.mrb[11].mxu1 }
 0x371   :  { %3298 = vtanh.f32 %v2831_v29 }
 0x37a   :  { %v3297_v32 = vpop.eup %3296 }
 0x37b   :  { %v3299_v33 = vpop.eup %3298  ;;  %2461 = vst [vmem:[#allocation2 + $0x20] sm:$0xff] %v3297_v32 }
 0x37c   :  { %2462 = vst [vmem:[#allocation2 + $0x28] sm:$0xff] %v3299_v33 }
 0x37d   :  { %3311 = shalt.err (!%p3308_p4)
}
 0x37e   :  { %s3312_s26 = scalar_lea.hbm %s4369_s7, 896 }
 0x37f   :  { %p3313_p5 = scmp.ne.s32.totalorder %s4369_s7, %s3312_s26  ;;  %p3316_p6 = scmp.lt.u32.totalorder %s3312_s26, %s4369_s7 }
 0x381   :  { %p3318_p7 = pnand %p3316_p6, %p3313_p5 }
 0x383   :  { %3321 = shalt.err (!%p3318_p7)
}
 0x384   :  { %2473 = dma.vmem_to_hbm [thread:$0]  %s2471_s6, 896, %s4369_s7, [#allocation3]  }
 0x385   :  { %3322 = dma.done.wait [#allocation3], 896  }
 0x386   :  { %3323 = vsyncadd [#allocation3], 4294966400 }
 0x387   :  { %2477 = vsyncpa [#allocation3], 1 }

</bundles_post_ra>
